<compile_context>
chip_gen: v7x
topology: tpu7x:2x2x1
jax: 0.10.0
libtpu: 0.0.40
codegen_flags: <defaults>
</compile_context>

<pallas_src>
import math

import jax
import jax.numpy as jnp
from jax import lax
from jax.experimental import pallas as pl
from jax.experimental.pallas import tpu as pltpu

IN_FEATURES = 28 * 28          # 784
H1, H2, H3 = 512, 256, 128
NEG_SLOPE = 0.2


def _leaky(x, slope=NEG_SLOPE):
    return jnp.where(x > 0, x, slope * x)


def _round_up(x, m):
    return ((x + m - 1) // m) * m


def discriminator_kernel(x_ref,
                         w1_ref, b1_ref,
                         w2_ref, b2_ref,
                         w3_ref, b3_ref,
                         w4t_ref, b4_ref,
                         out_ref):
    # x arrives as f32 straight from HBM; cast to bf16 in-kernel (MXU dtype),
    # saving the separate wrapper-side cast/pad pass over the input.
    x = x_ref[...].astype(jnp.bfloat16)                                        # (tb, 784)

    # fc1 + leaky_relu(0.2): bf16 MXU matmul, f32 accumulate, f32 elementwise
    h = jnp.dot(x, w1_ref[...], preferred_element_type=jnp.float32) + b1_ref[...]
    h = _leaky(h).astype(jnp.bfloat16)                                         # (tb, 512)

    # fc2 + leaky_relu(0.2)
    h = jnp.dot(h, w2_ref[...], preferred_element_type=jnp.float32) + b2_ref[...]
    h = _leaky(h).astype(jnp.bfloat16)                                         # (tb, 256)

    # fc3 + leaky_relu(0.2)
    h = jnp.dot(h, w3_ref[...], preferred_element_type=jnp.float32) + b3_ref[...]
    h = _leaky(h).astype(jnp.bfloat16)                                         # (tb, 128)

    # fc4 (single output unit): contract against the transposed weight row so the
    # result lands lane-dense as (1, tb):  out[0, j] = sum_k h[j, k] * w4[k].
    logit = lax.dot_general(w4t_ref[...], h, (((1,), (1,)), ((), ())),
                            preferred_element_type=jnp.float32) + b4_ref[...]
    out_ref[...] = jax.nn.sigmoid(logit)                                       # (1, tb)


def _choose_batch_tile(B, batch_tile):
    """Pick the batch tile: big (>=1024) when possible, >=2 grid steps for v7x megacore."""
    if B > batch_tile:
        return batch_tile                              # multiple of 256 by construction
    if B >= 512:
        # Split the batch so the "parallel" grid axis has >=2 steps (both v7x TCs busy).
        return min(batch_tile, _round_up(-(-B // 2), 256))
    return B                                           # single tile == full array dim (legal)


def discriminator_forward(x, params, *, batch_tile=1024):
    """x: (B, 1, 28, 28) or (B, 784) float -> (B, 1) float32 probabilities."""
    B = x.shape[0]
    xf = x.reshape(B, -1).astype(jnp.float32)          # (B, 784); no pad, cast stays in-kernel
    assert xf.shape[1] == IN_FEATURES

    tb = _choose_batch_tile(B, batch_tile)
    num_tiles = (B + tb - 1) // tb
    total = num_tiles * tb                             # padded batch; extra rows sliced off

    def _const(shape):
        # whole-array block, same block index every grid step -> stays VMEM-resident
        nd = len(shape)
        return pl.BlockSpec(shape, lambda i, _nd=nd: (0,) * _nd)

    flops = 2 * B * (IN_FEATURES * H1 + H1 * H2 + H2 * H3 + H3 * 1)
    weight_bytes = 2 * (IN_FEATURES * H1 + H1 * H2 + H2 * H3 + H3)             # bf16 weights
    bias_bytes = 4 * (H1 + H2 + H3 + 1)
    bytes_accessed = weight_bytes + bias_bytes + 4 * B * IN_FEATURES + 4 * B

    out = pl.pallas_call(
        discriminator_kernel,
        out_shape=jax.ShapeDtypeStruct((1, total), jnp.float32),
        grid=(num_tiles,),
        in_specs=[
            pl.BlockSpec((tb, IN_FEATURES), lambda i: (i, 0)),
            _const((IN_FEATURES, H1)), _const((1, H1)),
            _const((H1, H2)), _const((1, H2)),
            _const((H2, H3)), _const((1, H3)),
            _const((1, H3)),                       # w4 stored transposed: (1, 128)
            _const((1, 1)),                        # b4 scalar
        ],
        out_specs=pl.BlockSpec((1, tb), lambda i: (0, i)),
        compiler_params=pltpu.CompilerParams(
            dimension_semantics=("parallel",),
            vmem_limit_bytes=32 * 1024 * 1024,
        ),
        cost_estimate=pl.CostEstimate(
            flops=flops,
            transcendentals=B,
            bytes_accessed=bytes_accessed,
        ),
    )(xf,
      params["w1"], params["b1"],
      params["w2"], params["b2"],
      params["w3"], params["b3"],
      params["w4t"], params["b4"])

    return out[0, :B].reshape(B, 1)


def _linear_init(key, fan_in, fan_out):
    # PyTorch nn.Linear default init: U(-1/sqrt(fan_in), 1/sqrt(fan_in))
    kw, kb = jax.random.split(key)
    bound = 1.0 / math.sqrt(fan_in)
    w = jax.random.uniform(kw, (fan_in, fan_out), jnp.float32, -bound, bound)
    b = jax.random.uniform(kb, (1, fan_out), jnp.float32, -bound, bound)
    return w, b


def make_params(key):
    k1, k2, k3, k4 = jax.random.split(key, 4)
    w1, b1 = _linear_init(k1, IN_FEATURES, H1)
    w2, b2 = _linear_init(k2, H1, H2)
    w3, b3 = _linear_init(k3, H2, H3)
    w4, b4 = _linear_init(k4, H3, 1)
    return dict(
        w1=w1.astype(jnp.bfloat16), b1=b1,
        w2=w2.astype(jnp.bfloat16), b2=b2,
        w3=w3.astype(jnp.bfloat16), b3=b3,
        w4t=w4.T.astype(jnp.bfloat16),              # stored transposed (1, 128)
        b4=b4.reshape(1, 1),                        # scalar bias as (1, 1)
    )


def reference_forward(x, p):
    """Pure-JAX reference mirroring the kernel's bf16-input / f32-accumulate math."""
    B = x.shape[0]
    h = x.reshape(B, -1).astype(jnp.bfloat16).astype(jnp.float32)

    def fc(a_f32, w_bf16, b_f32):
        return jnp.dot(a_f32, w_bf16.astype(jnp.float32)) + b_f32

    h = _leaky(fc(h, p["w1"], p["b1"])).astype(jnp.bfloat16).astype(jnp.float32)
    h = _leaky(fc(h, p["w2"], p["b2"])).astype(jnp.bfloat16).astype(jnp.float32)
    h = _leaky(fc(h, p["w3"], p["b3"])).astype(jnp.bfloat16).astype(jnp.float32)
    logit = jnp.dot(h, p["w4t"].astype(jnp.float32).T) + p["b4"][0, 0]
    return jax.nn.sigmoid(logit)                    # (B, 1)


if __name__ == "__main__":
    key = jax.random.PRNGKey(0)
    kx, kp = jax.random.split(key)
    B = 8
    x = jax.random.normal(kx, (B, 1, 28, 28), jnp.float32)   # fake MNIST images
    params = make_params(kp)

    out = jax.block_until_ready(discriminator_forward(x, params))
    assert out.shape == (B, 1), out.shape

    ref = reference_forward(x, params)
    assert jnp.allclose(out, ref, atol=1e-3, rtol=1e-3), "mismatch vs pure-JAX reference"

    print("KERNEL_OK")
</pallas_src>

<mosaic_0001>
module attributes {stable_mosaic.version = 11 : i64} {
  func.func @discriminator_kernel(%arg0: i32, %arg1: memref<8x784xf32, #tpu.memory_space<vmem>>, %arg2: memref<784x512xbf16, #tpu.memory_space<vmem>>, %arg3: memref<1x512xf32, #tpu.memory_space<vmem>>, %arg4: memref<512x256xbf16, #tpu.memory_space<vmem>>, %arg5: memref<1x256xf32, #tpu.memory_space<vmem>>, %arg6: memref<256x128xbf16, #tpu.memory_space<vmem>>, %arg7: memref<1x128xf32, #tpu.memory_space<vmem>>, %arg8: memref<1x128xbf16, #tpu.memory_space<vmem>>, %arg9: memref<1x1xf32, #tpu.memory_space<vmem>>, %arg10: memref<1x8xf32, #tpu.memory_space<vmem>>) attributes {dimension_semantics = [#tpu.dimension_semantics<parallel>], iteration_bounds = array<i64: 1>, scalar_prefetch = 0 : i64, scratch_operands = 0 : i64, tpu.core_type = #tpu.core_type<tc>, window_params = [{transform_indices = @transform_0, window_bounds = array<i64: 8, 784>}, {pipeline_mode = #tpu.pipeline_mode<synchronous>, transform_indices = @transform_1, window_bounds = array<i64: 784, 512>}, {pipeline_mode = #tpu.pipeline_mode<synchronous>, transform_indices = @transform_2, window_bounds = array<i64: 1, 512>}, {pipeline_mode = #tpu.pipeline_mode<synchronous>, transform_indices = @transform_3, window_bounds = array<i64: 512, 256>}, {pipeline_mode = #tpu.pipeline_mode<synchronous>, transform_indices = @transform_4, window_bounds = array<i64: 1, 256>}, {pipeline_mode = #tpu.pipeline_mode<synchronous>, transform_indices = @transform_5, window_bounds = array<i64: 256, 128>}, {pipeline_mode = #tpu.pipeline_mode<synchronous>, transform_indices = @transform_6, window_bounds = array<i64: 1, 128>}, {pipeline_mode = #tpu.pipeline_mode<synchronous>, transform_indices = @transform_7, window_bounds = array<i64: 1, 128>}, {pipeline_mode = #tpu.pipeline_mode<synchronous>, transform_indices = @transform_8, window_bounds = array<i64: 1, 1>}, {transform_indices = @transform_9, window_bounds = array<i64: 1, 8>}]} {
    %c0 = arith.constant 0 : index
    %c0_0 = arith.constant 0 : index
    %0 = vector.load %arg1[%c0, %c0_0] : memref<8x784xf32, #tpu.memory_space<vmem>>, vector<8x784xf32>
    %1 = arith.truncf %0 : vector<8x784xf32> to vector<8x784xbf16>
    %c0_1 = arith.constant 0 : index
    %c0_2 = arith.constant 0 : index
    %2 = vector.load %arg2[%c0_1, %c0_2] : memref<784x512xbf16, #tpu.memory_space<vmem>>, vector<784x512xbf16>
    %cst = arith.constant dense<0.000000e+00> : vector<8x512xf32>
    %3 = tpu.matmul %1, %2, %cst {dimension_numbers = #tpu.dot_dimension_numbers<[1], [0], [0], [1], [0, 0, 1, 1], [], []>} : vector<8x784xbf16>, vector<784x512xbf16>, vector<8x512xf32> -> vector<8x512xf32>
    %c0_3 = arith.constant 0 : index
    %c0_4 = arith.constant 0 : index
    %4 = vector.load %arg3[%c0_3, %c0_4] : memref<1x512xf32, #tpu.memory_space<vmem>>, vector<1x512xf32>
    %5 = vector.broadcast %4 : vector<1x512xf32> to vector<8x512xf32>
    %6 = arith.addf %3, %5 : vector<8x512xf32>
    %cst_5 = arith.constant 0.000000e+00 : f32
    %7 = vector.broadcast %cst_5 : f32 to vector<8x512xf32>
    %8 = arith.cmpf ogt, %6, %7 : vector<8x512xf32>
    %cst_6 = arith.constant 2.000000e-01 : f32
    %9 = vector.broadcast %cst_6 : f32 to vector<8x512xf32>
    %10 = arith.mulf %9, %6 : vector<8x512xf32>
    %11 = arith.select %8, %6, %10 : vector<8x512xi1>, vector<8x512xf32>
    %12 = arith.truncf %11 : vector<8x512xf32> to vector<8x512xbf16>
    %c0_7 = arith.constant 0 : index
    %c0_8 = arith.constant 0 : index
    %13 = vector.load %arg4[%c0_7, %c0_8] : memref<512x256xbf16, #tpu.memory_space<vmem>>, vector<512x256xbf16>
    %cst_9 = arith.constant dense<0.000000e+00> : vector<8x256xf32>
    %14 = tpu.matmul %12, %13, %cst_9 {dimension_numbers = #tpu.dot_dimension_numbers<[1], [0], [0], [1], [0, 0, 1, 1], [], []>} : vector<8x512xbf16>, vector<512x256xbf16>, vector<8x256xf32> -> vector<8x256xf32>
    %c0_10 = arith.constant 0 : index
    %c0_11 = arith.constant 0 : index
    %15 = vector.load %arg5[%c0_10, %c0_11] : memref<1x256xf32, #tpu.memory_space<vmem>>, vector<1x256xf32>
    %16 = vector.broadcast %15 : vector<1x256xf32> to vector<8x256xf32>
    %17 = arith.addf %14, %16 : vector<8x256xf32>
    %cst_12 = arith.constant 0.000000e+00 : f32
    %18 = vector.broadcast %cst_12 : f32 to vector<8x256xf32>
    %19 = arith.cmpf ogt, %17, %18 : vector<8x256xf32>
    %cst_13 = arith.constant 2.000000e-01 : f32
    %20 = vector.broadcast %cst_13 : f32 to vector<8x256xf32>
    %21 = arith.mulf %20, %17 : vector<8x256xf32>
    %22 = arith.select %19, %17, %21 : vector<8x256xi1>, vector<8x256xf32>
    %23 = arith.truncf %22 : vector<8x256xf32> to vector<8x256xbf16>
    %c0_14 = arith.constant 0 : index
    %c0_15 = arith.constant 0 : index
    %24 = vector.load %arg6[%c0_14, %c0_15] : memref<256x128xbf16, #tpu.memory_space<vmem>>, vector<256x128xbf16>
    %cst_16 = arith.constant dense<0.000000e+00> : vector<8x128xf32>
    %25 = tpu.matmul %23, %24, %cst_16 {dimension_numbers = #tpu.dot_dimension_numbers<[1], [0], [0], [1], [0, 0, 1, 1], [], []>} : vector<8x256xbf16>, vector<256x128xbf16>, vector<8x128xf32> -> vector<8x128xf32>
    %c0_17 = arith.constant 0 : index
    %c0_18 = arith.constant 0 : index
    %26 = vector.load %arg7[%c0_17, %c0_18] : memref<1x128xf32, #tpu.memory_space<vmem>>, vector<1x128xf32>
    %27 = vector.broadcast %26 : vector<1x128xf32> to vector<8x128xf32>
    %28 = arith.addf %25, %27 : vector<8x128xf32>
    %cst_19 = arith.constant 0.000000e+00 : f32
    %29 = vector.broadcast %cst_19 : f32 to vector<8x128xf32>
    %30 = arith.cmpf ogt, %28, %29 : vector<8x128xf32>
    %cst_20 = arith.constant 2.000000e-01 : f32
    %31 = vector.broadcast %cst_20 : f32 to vector<8x128xf32>
    %32 = arith.mulf %31, %28 : vector<8x128xf32>
    %33 = arith.select %30, %28, %32 : vector<8x128xi1>, vector<8x128xf32>
    %34 = arith.truncf %33 : vector<8x128xf32> to vector<8x128xbf16>
    %c0_21 = arith.constant 0 : index
    %c0_22 = arith.constant 0 : index
    %35 = vector.load %arg8[%c0_21, %c0_22] : memref<1x128xbf16, #tpu.memory_space<vmem>>, vector<1x128xbf16>
    %cst_23 = arith.constant dense<0.000000e+00> : vector<1x8xf32>
    %36 = tpu.matmul %35, %34, %cst_23 {dimension_numbers = #tpu.dot_dimension_numbers<[1], [1], [0], [0], [0, 0, 1, 0], [], []>} : vector<1x128xbf16>, vector<8x128xbf16>, vector<1x8xf32> -> vector<1x8xf32>
    %c0_24 = arith.constant 0 : index
    %c0_25 = arith.constant 0 : index
    %37 = vector.load %arg9[%c0_24, %c0_25] : memref<1x1xf32, #tpu.memory_space<vmem>>, vector<1x1xf32>
    %38 = vector.broadcast %37 : vector<1x1xf32> to vector<1x8xf32>
    %39 = arith.addf %36, %38 : vector<1x8xf32>
    %40 = arith.negf %39 : vector<1x8xf32>
    %41 = math.exp %40 : vector<1x8xf32>
    %cst_26 = arith.constant 1.000000e+00 : f32
    %42 = vector.broadcast %cst_26 : f32 to vector<1x8xf32>
    %43 = arith.addf %42, %41 : vector<1x8xf32>
    %44 = arith.divf %42, %43 : vector<1x8xf32>
    %c0_27 = arith.constant 0 : index
    %c0_28 = arith.constant 0 : index
    %45 = vector.load %arg10[%c0_27, %c0_28] : memref<1x8xf32, #tpu.memory_space<vmem>>, vector<1x8xf32>
    tpu.vector_store %arg10[%c0_27, %c0_28], %44 {strides = array<i32>} : memref<1x8xf32, #tpu.memory_space<vmem>>, vector<1x8xf32>,
    return
  }
  func.func @transform_0(%arg0: i32) -> (i32, i32) {
    %c0_i32 = arith.constant 0 : i32
    %c0_i32_0 = arith.constant 0 : i32
    return %arg0, %c0_i32 : i32, i32
  }
  func.func @transform_1(%arg0: i32) -> (i32, i32) {
    %c0_i32 = arith.constant 0 : i32
    %c0_i32_0 = arith.constant 0 : i32
    %c0_i32_1 = arith.constant 0 : i32
    return %c0_i32, %c0_i32_0 : i32, i32
  }
  func.func @transform_2(%arg0: i32) -> (i32, i32) {
    %c0_i32 = arith.constant 0 : i32
    %c0_i32_0 = arith.constant 0 : i32
    %c0_i32_1 = arith.constant 0 : i32
    return %c0_i32, %c0_i32_0 : i32, i32
  }
  func.func @transform_3(%arg0: i32) -> (i32, i32) {
    %c0_i32 = arith.constant 0 : i32
    %c0_i32_0 = arith.constant 0 : i32
    %c0_i32_1 = arith.constant 0 : i32
    return %c0_i32, %c0_i32_0 : i32, i32
  }
  func.func @transform_4(%arg0: i32) -> (i32, i32) {
    %c0_i32 = arith.constant 0 : i32
    %c0_i32_0 = arith.constant 0 : i32
    %c0_i32_1 = arith.constant 0 : i32
    return %c0_i32, %c0_i32_0 : i32, i32
  }
  func.func @transform_5(%arg0: i32) -> (i32, i32) {
    %c0_i32 = arith.constant 0 : i32
    %c0_i32_0 = arith.constant 0 : i32
    %c0_i32_1 = arith.constant 0 : i32
    return %c0_i32, %c0_i32_0 : i32, i32
  }
  func.func @transform_6(%arg0: i32) -> (i32, i32) {
    %c0_i32 = arith.constant 0 : i32
    %c0_i32_0 = arith.constant 0 : i32
    %c0_i32_1 = arith.constant 0 : i32
    return %c0_i32, %c0_i32_0 : i32, i32
  }
  func.func @transform_7(%arg0: i32) -> (i32, i32) {
    %c0_i32 = arith.constant 0 : i32
    %c0_i32_0 = arith.constant 0 : i32
    %c0_i32_1 = arith.constant 0 : i32
    return %c0_i32, %c0_i32_0 : i32, i32
  }
  func.func @transform_8(%arg0: i32) -> (i32, i32) {
    %c0_i32 = arith.constant 0 : i32
    %c0_i32_0 = arith.constant 0 : i32
    %c0_i32_1 = arith.constant 0 : i32
    return %c0_i32, %c0_i32_0 : i32, i32
  }
  func.func @transform_9(%arg0: i32) -> (i32, i32) {
    %c0_i32 = arith.constant 0 : i32
    %c0_i32_0 = arith.constant 0 : i32
    return %c0_i32, %arg0 : i32, i32
  }
}

</mosaic_0001>

<bundles_post_ra>
// kernel: tpu_custom_call.1
= control target key start
LH: loop header
LB: loop body
LE: loop exit
PB: predicated region body
PF: predicated region fallthrough
CT: control target
= control target key end

     0   :  { %s3466_s0 = inlined_call_operand.hbm [shape: f32[8,784], index: 0, kind: input, shape index: {}]   ;;  %s3467_s1 = inlined_call_operand.hbm [shape: bf16[784,512], index: 1, kind: input, shape index: {}]   ;;  %s3468_s2 = inlined_call_operand.vmem [shape: f32[1,512], index: 2, kind: input, shape index: {}]   ;;  %s3469_s3 = inlined_call_operand.hbm [shape: bf16[512,256], index: 3, kind: input, shape index: {}]   ;;  %s3470_s4 = inlined_call_operand.vmem [shape: f32[1,256], index: 4, kind: input, shape index: {}]   ;;  %s3471_s5 = inlined_call_operand.hbm [shape: bf16[256,128], index: 5, kind: input, shape index: {}]   ;;  %s3472_s6 = inlined_call_operand.vmem [shape: f32[1,128], index: 6, kind: input, shape index: {}]   ;;  %s3473_s7 = inlined_call_operand.vmem [shape: bf16[1,128], index: 7, kind: input, shape index: {}]   ;;  %s3474_s8 = inlined_call_operand.<no memory space> [shape: f32[1,1], index: 8, kind: input, shape index: {}]   ;;  %s3475_s9 = inlined_call_operand.hbm [shape: f32[1,8], index: 9, kind: output, shape index: {}]  }
   0x1   :  { %v14_v0 = vstv %s3474_s8 }
   0x2   :  { %15 = vst [vmem:[#allocation2] sm:$0x1] %v14_v0 }
   0x3   :  { %16 = vsyncpa [#allocation4], 0 }
   0x4   :  { %17 = vsyncpa [#allocation7], 0 }
   0x5   :  { %18 = vsyncpa [#allocation10], 0 }
   0x6   :  { %19 = vsyncpa [#allocation5], 0  ;;  %s3273_s11 = smov [#allocation6]   ;;  %s3155_s15 = scalar_lea.hbm %s3467_s1, 25088 }
   0x7   :  { %s35_s12 = sshll.u32 %s3273_s11, 4  ;;  %p3156_p0 = scmp.ne.s32.totalorder %s3467_s1, %s3155_s15  ;;  %s36_s12 = int_to_ptr.vmem [resolvable:$true] %s35_s12 }
   0x8   :  { %p3159_p1 = scmp.lt.u32.totalorder %s3155_s15, %s3467_s1 }
   0xa   :  { %p3161_p2 = pnand %p3159_p1, %p3156_p0 }
   0xc   :  { %3164 = shalt.err (!%p3161_p2)
}
   0xd   :  { %s3165_s8 = scalar_lea.vmem %s36_s12, 25088  ;;  %p3170_p4 = scmp.lt.s32.totalorder %s36_s12, %s36_s12 }
   0xe   :  { %p3166_p3 = scmp.ne.s32.totalorder %s36_s12, %s3165_s8  ;;  %p3171_p5 = scmp.lt.s32.totalorder %s3165_s8, %s3165_s8 }
  0x10   :  { %p3172_p6 = por %p3171_p5, %p3170_p4 }
  0x12   :  { %p3173_p7 = pnand %p3172_p6, %p3166_p3 }
  0x14   :  { %3176 = shalt.err (!%p3173_p7)
}
  0x15   :  { %s3274_s20 = smov 256   ;;  %s3275_s21 = smov 16  }
  0x16   :  { %41 = dma.hbm_to_vmem [thread:$0]  %s3467_s1, 25088, %s36_s12, [#allocation7], %s3274_s20, %s3274_s20, %s3275_s21  }
  0x17   :  { %s3276_s24 = smov [#allocation3]   ;;  %s3277_s26 = smov [#allocation8]  }
  0x18   :  { %s26_s25 = sshll.u32 %s3276_s24, 4  ;;  %s49_s27 = sshll.u32 %s3277_s26, 4  ;;  %s27_s25 = int_to_ptr.vmem [resolvable:$true] %s26_s25  ;;  %s50_s27 = int_to_ptr.vmem [resolvable:$true] %s49_s27 }
  0x19   :  { %s3177_s30 = scalar_lea.hbm %s3466_s0, 896 }
  0x1a   :  { %p3178_p8 = scmp.ne.s32.totalorder %s3466_s0, %s3177_s30  ;;  %p3181_p9 = scmp.lt.u32.totalorder %s3177_s30, %s3466_s0 }
  0x1c   :  { %p3183_p10 = pnand %p3181_p9, %p3178_p8 }
  0x1e   :  { %3186 = shalt.err (!%p3183_p10)
}
  0x1f   :  { %s3187_s1 = scalar_lea.vmem %s27_s25, 896  ;;  %p3192_p12 = scmp.lt.s32.totalorder %s27_s25, %s27_s25 }
  0x20   :  { %p3188_p11 = scmp.ne.s32.totalorder %s27_s25, %s3187_s1  ;;  %p3193_p13 = scmp.lt.s32.totalorder %s3187_s1, %s3187_s1 }
  0x22   :  { %p3194_p0 = por %p3193_p13, %p3192_p12 }
  0x24   :  { %p3195_p1 = pnand %p3194_p0, %p3188_p11 }
  0x26   :  { %3198 = shalt.err (!%p3195_p1)
}
  0x27   :  { %29 = dma.hbm_to_vmem [thread:$0]  %s3466_s0, 896, %s27_s25, [#allocation4]  }
  0x28   :  { %s3199_s18 = scalar_lea.hbm %s3469_s3, 8192 }
  0x29   :  { %p3200_p2 = scmp.ne.s32.totalorder %s3469_s3, %s3199_s18  ;;  %p3203_p3 = scmp.lt.u32.totalorder %s3199_s18, %s3469_s3 }
  0x2b   :  { %p3205_p4 = pnand %p3203_p3, %p3200_p2 }
  0x2d   :  { %3208 = shalt.err (!%p3205_p4)
}
  0x2e   :  { %s3209_s22 = scalar_lea.vmem %s50_s27, 8192  ;;  %p3214_p6 = scmp.lt.s32.totalorder %s50_s27, %s50_s27 }
  0x2f   :  { %p3210_p5 = scmp.ne.s32.totalorder %s50_s27, %s3209_s22  ;;  %p3215_p7 = scmp.lt.s32.totalorder %s3209_s22, %s3209_s22 }
  0x31   :  { %p3216_p8 = por %p3215_p7, %p3214_p6 }
  0x33   :  { %p3217_p9 = pnand %p3216_p8, %p3210_p5 }
  0x35   :  { %3220 = shalt.err (!%p3217_p9)
}
  0x36   :  { %s3278_s0 = smov 128   ;;  %s3279_s23 = smov 8  }
  0x37   :  { %55 = dma.hbm_to_vmem [thread:$0]  %s3469_s3, 8192, %s50_s27, [#allocation7], %s3278_s0, %s3278_s0, %s3279_s23  }
  0x38   :  { %s3280_s26 = smov [#allocation9]   ;;  %s3221_s10 = scalar_lea.hbm %s3471_s5, 2048 }
  0x39   :  { %s63_s28 = sshll.u32 %s3280_s26, 4  ;;  %p3222_p10 = scmp.ne.s32.totalorder %s3471_s5, %s3221_s10  ;;  %s64_s28 = int_to_ptr.vmem [resolvable:$true] %s63_s28 }
  0x3a   :  { %p3225_p11 = scmp.lt.u32.totalorder %s3221_s10, %s3471_s5 }
  0x3c   :  { %p3227_p12 = pnand %p3225_p11, %p3222_p10 }
  0x3e   :  { %3230 = shalt.err (!%p3227_p12)
}
  0x3f   :  { %s3231_s12 = scalar_lea.vmem %s64_s28, 2048  ;;  %p3236_p0 = scmp.lt.s32.totalorder %s64_s28, %s64_s28 }
  0x40   :  { %p3232_p13 = scmp.ne.s32.totalorder %s64_s28, %s3231_s12  ;;  %p3237_p1 = scmp.lt.s32.totalorder %s3231_s12, %s3231_s12 }
  0x42   :  { %p3238_p2 = por %p3237_p1, %p3236_p0 }
  0x44   :  { %p3239_p3 = pnand %p3238_p2, %p3232_p13 }
  0x46   :  { %3242 = shalt.err (!%p3239_p3)
}
  0x47   :  { %s3281_s3 = smov 64   ;;  %s3282_s27 = smov 4  }
  0x48   :  { %69 = dma.hbm_to_vmem [thread:$0]  %s3471_s5, 2048, %s64_s28, [#allocation10], %s3281_s3, %s3281_s3, %s3282_s27  }
  0x49   :  { %3265 = dma.done.wait [#allocation4], 896  }
  0x4a   :  { %3266 = vsyncadd [#allocation4], 4294966400 }
  0x4b   :  { %3267 = dma.done.wait [#allocation7], 33280  }
  0x4c   :  { %3268 = vsyncadd [#allocation7], 4294934016 }
  0x4d   :  { %3269 = dma.done.wait [#allocation10], 2048  }
  0x4e   :  { %3270 = vsyncadd [#allocation10], 4294965248  ;;  %v2745_v1 = vld [vmem:[#allocation6 + $0x4] ss:$16 sps:$4 sm:$0xff]   ;;  %v2749_v3 = vld [vmem:[#allocation6] ss:$16 sps:$4 sm:$0xff]  }
  0x4f   :  { %v2747_v2 = vld [vmem:[#allocation6 + $0x204] ss:$16 sps:$4 sm:$0xff]   ;;  %1305 = vmatprep.subr.bf16.mxu1 %v2745_v1  ;;  %v2750_v4 = vld [vmem:[#allocation6 + $0x200] ss:$16 sps:$4 sm:$0xff]   ;;  %v3283_v19 = vmov 0   ;;  %vm1301_vm0 = vcmask 130048  }
  0x50   :  { %1346 = vmatprep.subr.bf16.mxu0 %v2747_v2  ;;  %v2751_v5 = vld [vmem:[#allocation6 + $0x24] ss:$16 sps:$4 sm:$0xff]   ;;  %1306 = vmatpush1.bf16.msra.mxu1 %v2749_v3  ;;  %v2755_v7 = vld [vmem:[#allocation6 + $0x20] ss:$16 sps:$4 sm:$0xff]   ;;  %vm3285_vm7 = vmmov 0   ;;  %vm2371_vm9 = vcmask 57344  }
  0x51   :  { %1347 = vmatpush1.bf16.msra.mxu0 %v2750_v4  ;;  %v2753_v6 = vld [vmem:[#allocation6 + $0x224] ss:$16 sps:$4 sm:$0xff]   ;;  %1307 = vmatprep.subr.bf16.mxu1 %v2751_v5  ;;  %v2756_v8 = vld [vmem:[#allocation6 + $0x220] ss:$16 sps:$4 sm:$0xff]  }
  0x52   :  { %1348 = vmatprep.subr.bf16.mxu0 %v2753_v6  ;;  %v2757_v9 = vld [vmem:[#allocation6 + $0x44] ss:$16 sps:$4 sm:$0xff]   ;;  %v2761_v11 = vld [vmem:[#allocation6 + $0x40] ss:$16 sps:$4 sm:$0xff]   ;;  %2744 = vset.pattern.permute.xlu0 %v3283_v19  ;;  %v89_v6 = vld [vmem:[#allocation3] sm:$0xff] }
  0x53   :  { %v2759_v10 = vld [vmem:[#allocation6 + $0x244] ss:$16 sps:$4 sm:$0xff]   ;;  %v2762_v12 = vld [vmem:[#allocation6 + $0x240] ss:$16 sps:$4 sm:$0xff]  }
  0x54   :  { %1308 = vmatpush1.bf16.msra.mxu1 %v2755_v7  ;;  %v2763_v13 = vld [vmem:[#allocation6 + $0x64] ss:$16 sps:$4 sm:$0xff]   ;;  %v2767_v15 = vld [vmem:[#allocation6 + $0x60] ss:$16 sps:$4 sm:$0xff]  }
  0x55   :  { %1349 = vmatpush1.bf16.msra.mxu0 %v2756_v8  ;;  %1309 = vmatprep.subr.bf16.mxu1 %v2757_v9  ;;  %v2765_v14 = vld [vmem:[#allocation6 + $0x264] ss:$16 sps:$4 sm:$0xff]   ;;  %v2768_v16 = vld [vmem:[#allocation6 + $0x260] ss:$16 sps:$4 sm:$0xff]   ;;  %v91_v8 = vld [vmem:[#allocation3 + $0x10] sm:$0xff] }
  0x56   :  { %1350 = vmatprep.subr.bf16.mxu0 %v2759_v10  ;;  %v2769_v17 = vld [vmem:[#allocation6 + $0x84] ss:$16 sps:$4 sm:$0xff]   ;;  %v2773_v20 = vld [vmem:[#allocation6 + $0x80] ss:$16 sps:$4 sm:$0xff]   ;;  %v2846_v9 = vld [vmem:[#allocation6 + $0xc] ss:$16 sps:$4 sm:$0xff]   ;;  %v3395_v10 = vpack.c.bf16 %v89_v6, %v89_v6 }
  0x57   :  { %v2771_v18 = vld [vmem:[#allocation6 + $0x284] ss:$16 sps:$4 sm:$0xff]   ;;  %v2774_v21 = vld [vmem:[#allocation6 + $0x280] ss:$16 sps:$4 sm:$0xff]  }
  0x58   :  { %1310 = vmatpush1.bf16.msra.mxu1 %v2761_v11  ;;  %v2775_v22 = vld [vmem:[#allocation6 + $0xa4] ss:$16 sps:$4 sm:$0xff]   ;;  %v2779_v24 = vld [vmem:[#allocation6 + $0xa0] ss:$16 sps:$4 sm:$0xff]  }
  0x59   :  { %1351 = vmatpush1.bf16.msra.mxu0 %v2762_v12  ;;  %1311 = vmatprep.subr.bf16.mxu1 %v2763_v13  ;;  %v2777_v23 = vld [vmem:[#allocation6 + $0x2a4] ss:$16 sps:$4 sm:$0xff]   ;;  %v2780_v25 = vld [vmem:[#allocation6 + $0x2a0] ss:$16 sps:$4 sm:$0xff]   ;;  %v2844_v12 = vld [vmem:[#allocation6 + $0x8] ss:$16 sps:$4 sm:$0xff]   ;;  %v3397_v13 = vpack.c.bf16 %v91_v8, %v91_v8 }
  0x5a   :  { %1352 = vmatprep.subr.bf16.mxu0 %v2765_v14  ;;  %v2781_v26 = vld [vmem:[#allocation6 + $0xc4] ss:$16 sps:$4 sm:$0xff]   ;;  %v2785_v28 = vld [vmem:[#allocation6 + $0xc0] ss:$16 sps:$4 sm:$0xff]  }
  0x5b   :  { %v2783_v27 = vld [vmem:[#allocation6 + $0x2c4] ss:$16 sps:$4 sm:$0xff]   ;;  %v2786_v29 = vld [vmem:[#allocation6 + $0x2c0] ss:$16 sps:$4 sm:$0xff]  }
  0x5c   :  { %1312 = vmatpush1.bf16.msra.mxu1 %v2767_v15  ;;  %v2787_v30 = vld [vmem:[#allocation6 + $0xe4] ss:$16 sps:$4 sm:$0xff]   ;;  %v2791_v32 = vld [vmem:[#allocation6 + $0xe0] ss:$16 sps:$4 sm:$0xff]   ;;  %v2852_v15 = vld [vmem:[#allocation6 + $0x2c] ss:$16 sps:$4 sm:$0xff]  }
  0x5d   :  { %1353 = vmatpush1.bf16.msra.mxu0 %v2768_v16  ;;  %1313 = vmatprep.subr.bf16.mxu1 %v2769_v17  ;;  %v2789_v31 = vld [vmem:[#allocation6 + $0x2e4] ss:$16 sps:$4 sm:$0xff]   ;;  %v2792_v33 = vld [vmem:[#allocation6 + $0x2e0] ss:$16 sps:$4 sm:$0xff]   ;;  %v2850_v17 = vld [vmem:[#allocation6 + $0x28] ss:$16 sps:$4 sm:$0xff]  }
  0x5e   :  { %1354 = vmatprep.subr.bf16.mxu0 %v2771_v18  ;;  %v2793_v34 = vld [vmem:[#allocation6 + $0x104] ss:$16 sps:$4 sm:$0xff]   ;;  %v2797_v36 = vld [vmem:[#allocation6 + $0x100] ss:$16 sps:$4 sm:$0xff]  }
  0x5f   :  { %v2795_v35 = vld [vmem:[#allocation6 + $0x304] ss:$16 sps:$4 sm:$0xff]   ;;  %v2798_v37 = vld [vmem:[#allocation6 + $0x300] ss:$16 sps:$4 sm:$0xff]  }
  0x60   :  { %1314 = vmatpush1.bf16.msra.mxu1 %v2773_v20  ;;  %v2799_v38 = vld [vmem:[#allocation6 + $0x124] ss:$16 sps:$4 sm:$0xff]   ;;  %v2803_v40 = vld [vmem:[#allocation6 + $0x120] ss:$16 sps:$4 sm:$0xff]   ;;  %v2858_v20 = vld [vmem:[#allocation6 + $0x4c] ss:$16 sps:$4 sm:$0xff]  }
  0x61   :  { %1355 = vmatpush1.bf16.msra.mxu0 %v2774_v21  ;;  %1315 = vmatprep.subr.bf16.mxu1 %v2775_v22  ;;  %v2801_v39 = vld [vmem:[#allocation6 + $0x324] ss:$16 sps:$4 sm:$0xff]   ;;  %v2804_v41 = vld [vmem:[#allocation6 + $0x320] ss:$16 sps:$4 sm:$0xff]   ;;  %v2856_v22 = vld [vmem:[#allocation6 + $0x48] ss:$16 sps:$4 sm:$0xff]  }
  0x62   :  { %1356 = vmatprep.subr.bf16.mxu0 %v2777_v23  ;;  %v2805_v42 = vld [vmem:[#allocation6 + $0x144] ss:$16 sps:$4 sm:$0xff]   ;;  %v2809_v44 = vld [vmem:[#allocation6 + $0x140] ss:$16 sps:$4 sm:$0xff]  }
  0x63   :  { %v2807_v43 = vld [vmem:[#allocation6 + $0x344] ss:$16 sps:$4 sm:$0xff]   ;;  %v2810_v45 = vld [vmem:[#allocation6 + $0x340] ss:$16 sps:$4 sm:$0xff]  }
  0x64   :  { %1316 = vmatpush1.bf16.msra.mxu1 %v2779_v24  ;;  %v2811_v46 = vld [vmem:[#allocation6 + $0x164] ss:$16 sps:$4 sm:$0xff]   ;;  %v2815_v49 = vld [vmem:[#allocation6 + $0x160] ss:$16 sps:$4 sm:$0xff]   ;;  %v2864_v24 = vld [vmem:[#allocation6 + $0x6c] ss:$16 sps:$4 sm:$0xff]  }
  0x65   :  { %1357 = vmatpush1.bf16.msra.mxu0 %v2780_v25  ;;  %1317 = vmatprep.subr.bf16.mxu1 %v2781_v26  ;;  %v2813_v47 = vld [vmem:[#allocation6 + $0x364] ss:$16 sps:$4 sm:$0xff]   ;;  %v2816_v52 = vld [vmem:[#allocation6 + $0x360] ss:$16 sps:$4 sm:$0xff]   ;;  %v2862_v26 = vld [vmem:[#allocation6 + $0x68] ss:$16 sps:$4 sm:$0xff]  }
  0x66   :  { %1358 = vmatprep.subr.bf16.mxu0 %v2783_v27  ;;  %v90_v48 = vld [vmem:[#allocation3 + $0x8] sm:$0xff]  ;;  %v92_v51 = vld [vmem:[#allocation3 + $0x18] sm:$0xff] }
  0x67   :  { %v3389_v50 = vpack.c.bf16 %v90_v48, %v90_v48  ;;  %v2817_v53 = vld [vmem:[#allocation6 + $0x184] ss:$16 sps:$4 sm:$0xff]   ;;  %v3391_v54 = vpack.c.bf16 %v92_v51, %v92_v51  ;;  %v2821_v56 = vld [vmem:[#allocation6 + $0x180] ss:$16 sps:$4 sm:$0xff]   ;;  %v2892_v48 = vld [vmem:[#allocation6 + $0x108] ss:$16 sps:$4 sm:$0xff]  }
  0x68   :  { %1318 = vmatpush1.bf16.msra.mxu1 %v2785_v28  ;;  %v2819_v55 = vld [vmem:[#allocation6 + $0x384] ss:$16 sps:$4 sm:$0xff]   ;;  %v2822_v57 = vld [vmem:[#allocation6 + $0x380] ss:$16 sps:$4 sm:$0xff]   ;;  %v2870_v28 = vld [vmem:[#allocation6 + $0x8c] ss:$16 sps:$4 sm:$0xff]  }
  0x69   :  { %1359 = vmatpush1.bf16.msra.mxu0 %v2786_v29  ;;  %1319 = vmatprep.subr.bf16.mxu1 %v2787_v30  ;;  %v2823_v58 = vld [vmem:[#allocation6 + $0x1a4] ss:$16 sps:$4 sm:$0xff]   ;;  %v2827_v60 = vld [vmem:[#allocation6 + $0x1a0] ss:$16 sps:$4 sm:$0xff]   ;;  %v2868_v30 = vld [vmem:[#allocation6 + $0x88] ss:$16 sps:$4 sm:$0xff]  }
  0x6a   :  { %1360 = vmatprep.subr.bf16.mxu0 %v2789_v31  ;;  %1337 = vmatprep.mubr.bf16.mxu1 %v3389_v50  ;;  %v2825_v59 = vld [vmem:[#allocation6 + $0x3a4] ss:$16 sps:$4 sm:$0xff]   ;;  %v2828_v61 = vld [vmem:[#allocation6 + $0x3a0] ss:$16 sps:$4 sm:$0xff]  }
  0x6b   :  { %1378 = vmatprep.mubr.bf16.mxu0 %v3391_v54  ;;  %v2829_v62 = vld [vmem:[#allocation6 + $0x1c4] ss:$16 sps:$4 sm:$0xff]   ;;  %v2833_v0 = vld [vmem:[#allocation6 + $0x1c0] ss:$16 sps:$4 sm:$0xff]  }
  0x6c   :  { %1320 = vmatpush1.bf16.msra.mxu1 %v2791_v32  ;;  %v2831_v63 = vld [vmem:[#allocation6 + $0x3c4] ss:$16 sps:$4 sm:$0xff]   ;;  %v2834_v1 = vld [vmem:[#allocation6 + $0x3c0] ss:$16 sps:$4 sm:$0xff]   ;;  %v2876_v32 = vld [vmem:[#allocation6 + $0xac] ss:$16 sps:$4 sm:$0xff]  }
  0x6d   :  { %1361 = vmatpush1.bf16.msra.mxu0 %v2792_v33  ;;  %1321 = vmatprep.subr.bf16.mxu1 %v2793_v34  ;;  %v2835_v2 = vld [vmem:[#allocation6 + $0x1e4] ss:$16 sps:$4 sm:$0xff]   ;;  %v2839_v4 = vld [vmem:[#allocation6 + $0x1e0] ss:$16 sps:$4 sm:$0xff]   ;;  %v2874_v34 = vld [vmem:[#allocation6 + $0xa8] ss:$16 sps:$4 sm:$0xff]  }
  0x6e   :  { %1362 = vmatprep.subr.bf16.mxu0 %v2795_v35  ;;  %v2837_v3 = vld [vmem:[#allocation6 + $0x3e4] ss:$16 sps:$4 sm:$0xff]   ;;  %v2840_v5 = vld [vmem:[#allocation6 + $0x3e0] ss:$16 sps:$4 sm:$0xff]  }
  0x6f   :  { %v2843_v7 = vld [vmem:[#allocation6 + $0x404] ss:$16 sps:$4 sm:$0xff]   ;;  %v2841_v11 = vld [vmem:[#allocation6 + $0x400] ss:$16 sps:$4 sm:$0xff]  }
  0x70   :  { %1322 = vmatpush1.bf16.msra.mxu1 %v2797_v36  ;;  %v2849_v14 = vld [vmem:[#allocation6 + $0x424] ss:$16 sps:$4 sm:$0xff]   ;;  %v2847_v16 = vld [vmem:[#allocation6 + $0x420] ss:$16 sps:$4 sm:$0xff]   ;;  %v2882_v36 = vld [vmem:[#allocation6 + $0xcc] ss:$16 sps:$4 sm:$0xff]  }
  0x71   :  { %1363 = vmatpush1.bf16.msra.mxu0 %v2798_v37  ;;  %1323 = vmatprep.subr.bf16.mxu1 %v2799_v38  ;;  %v2855_v18 = vld [vmem:[#allocation6 + $0x444] ss:$16 sps:$4 sm:$0xff]   ;;  %v2853_v21 = vld [vmem:[#allocation6 + $0x440] ss:$16 sps:$4 sm:$0xff]  }
  0x72   :  { %1364 = vmatprep.subr.bf16.mxu0 %v2801_v39  ;;  %v2861_v23 = vld [vmem:[#allocation6 + $0x464] ss:$16 sps:$4 sm:$0xff]   ;;  %v2859_v25 = vld [vmem:[#allocation6 + $0x460] ss:$16 sps:$4 sm:$0xff]  }
  0x73   :  { %v2867_v27 = vld [vmem:[#allocation6 + $0x484] ss:$16 sps:$4 sm:$0xff]   ;;  %v2865_v29 = vld [vmem:[#allocation6 + $0x480] ss:$16 sps:$4 sm:$0xff]  }
  0x74   :  { %1324 = vmatpush1.bf16.msra.mxu1 %v2803_v40  ;;  %v2873_v31 = vld [vmem:[#allocation6 + $0x4a4] ss:$16 sps:$4 sm:$0xff]   ;;  %v2871_v33 = vld [vmem:[#allocation6 + $0x4a0] ss:$16 sps:$4 sm:$0xff]   ;;  %v2880_v40 = vld [vmem:[#allocation6 + $0xc8] ss:$16 sps:$4 sm:$0xff]  }
  0x75   :  { %1365 = vmatpush1.bf16.msra.mxu0 %v2804_v41  ;;  %1325 = vmatprep.subr.bf16.mxu1 %v2805_v42  ;;  %v2879_v35 = vld [vmem:[#allocation6 + $0x4c4] ss:$16 sps:$4 sm:$0xff]   ;;  %v2877_v39 = vld [vmem:[#allocation6 + $0x4c0] ss:$16 sps:$4 sm:$0xff]   ;;  %v2888_v42 = vld [vmem:[#allocation6 + $0xec] ss:$16 sps:$4 sm:$0xff]  }
  0x76   :  { %1366 = vmatprep.subr.bf16.mxu0 %v2807_v43  ;;  %v94_v37 = vld [vmem:[#allocation3 + $0x28] sm:$0xff] }
  0x77   :  { %v3402_v38 = vpack.c.bf16 %v94_v37, %v94_v37  ;;  %v2885_v41 = vld [vmem:[#allocation6 + $0x4e4] ss:$16 sps:$4 sm:$0xff]   ;;  %v2883_v43 = vld [vmem:[#allocation6 + $0x4e0] ss:$16 sps:$4 sm:$0xff]   ;;  %v2963_v37 = vld [vmem:[#allocation6 + $0x2ec] ss:$16 sps:$4 sm:$0xff]  }
  0x78   :  { %1326 = vmatpush1.bf16.msra.mxu1 %v2809_v44  ;;  %v2886_v44 = vld [vmem:[#allocation6 + $0xe8] ss:$16 sps:$4 sm:$0xff]   ;;  %v2895_v51 = vld [vmem:[#allocation6 + $0x520] ss:$16 sps:$4 sm:$0xff]   ;;  %v2927_v6 = vld [vmem:[#allocation6 + $0x5c4] ss:$16 sps:$4 sm:$0xff]  }
  0x79   :  { %1367 = vmatpush1.bf16.msra.mxu0 %v2810_v45  ;;  %1327 = vmatprep.subr.bf16.mxu1 %v2811_v46  ;;  %v2891_v45 = vld [vmem:[#allocation6 + $0x504] ss:$16 sps:$4 sm:$0xff]   ;;  %v2894_v46 = vld [vmem:[#allocation6 + $0x10c] ss:$16 sps:$4 sm:$0xff]   ;;  %v2925_v8 = vld [vmem:[#allocation6 + $0x5c0] ss:$16 sps:$4 sm:$0xff]  }
  0x7a   :  { %1368 = vmatprep.subr.bf16.mxu0 %v2813_v47  ;;  %v2889_v47 = vld [vmem:[#allocation6 + $0x500] ss:$16 sps:$4 sm:$0xff]  }
  0x7c   :  { %1328 = vmatpush1.bf16.msra.mxu1 %v2815_v49  ;;  %v2897_v49 = vld [vmem:[#allocation6 + $0x524] ss:$16 sps:$4 sm:$0xff]  }
  0x7d   :  { %1369 = vmatpush1.bf16.msra.mxu0 %v2816_v52  ;;  %1329 = vmatprep.subr.bf16.mxu1 %v2817_v53  ;;  %v2898_v52 = vld [vmem:[#allocation6 + $0x128] ss:$16 sps:$4 sm:$0xff]   ;;  %v2903_v53 = vld [vmem:[#allocation6 + $0x544] ss:$16 sps:$4 sm:$0xff]  }
  0x7e   :  { %1370 = vmatprep.subr.bf16.mxu0 %v2819_v55  ;;  %v2906_v55 = vld [vmem:[#allocation6 + $0x14c] ss:$16 sps:$4 sm:$0xff]  }
  0x80   :  { %1330 = vmatpush1.bf16.msra.mxu1 %v2821_v56  ;;  %v2901_v56 = vld [vmem:[#allocation6 + $0x540] ss:$16 sps:$4 sm:$0xff]  }
  0x81   :  { %1371 = vmatpush1.bf16.msra.mxu0 %v2822_v57  ;;  %1331 = vmatprep.subr.bf16.mxu1 %v2823_v58  ;;  %v2904_v57 = vld [vmem:[#allocation6 + $0x148] ss:$16 sps:$4 sm:$0xff]   ;;  %v2909_v58 = vld [vmem:[#allocation6 + $0x564] ss:$16 sps:$4 sm:$0xff]  }
  0x82   :  { %1372 = vmatprep.subr.bf16.mxu0 %v2825_v59  ;;  %v2912_v59 = vld [vmem:[#allocation6 + $0x16c] ss:$16 sps:$4 sm:$0xff]  }
  0x84   :  { %1332 = vmatpush1.bf16.msra.mxu1 %v2827_v60  ;;  %v2907_v60 = vld [vmem:[#allocation6 + $0x560] ss:$16 sps:$4 sm:$0xff]  }
  0x85   :  { %1373 = vmatpush1.bf16.msra.mxu0 %v2828_v61  ;;  %1333 = vmatprep.subr.bf16.mxu1 %v2829_v62  ;;  %v2910_v61 = vld [vmem:[#allocation6 + $0x168] ss:$16 sps:$4 sm:$0xff]   ;;  %v2915_v62 = vld [vmem:[#allocation6 + $0x584] ss:$16 sps:$4 sm:$0xff]  }
  0x86   :  { %1374 = vmatprep.subr.bf16.mxu0 %v2831_v63  ;;  %v2918_v63 = vld [vmem:[#allocation6 + $0x18c] ss:$16 sps:$4 sm:$0xff]  }
  0x88   :  { %1334 = vmatpush1.bf16.msra.mxu1 %v2833_v0  ;;  %v2913_v0 = vld [vmem:[#allocation6 + $0x580] ss:$16 sps:$4 sm:$0xff]  }
  0x89   :  { %1375 = vmatpush1.bf16.msra.mxu0 %v2834_v1  ;;  %1335 = vmatprep.subr.bf16.mxu1 %v2835_v2  ;;  %v2916_v1 = vld [vmem:[#allocation6 + $0x188] ss:$16 sps:$4 sm:$0xff]   ;;  %v2921_v2 = vld [vmem:[#allocation6 + $0x5a4] ss:$16 sps:$4 sm:$0xff]  }
  0x8a   :  { %1376 = vmatprep.subr.bf16.mxu0 %v2837_v3  ;;  %v2924_v3 = vld [vmem:[#allocation6 + $0x1ac] ss:$16 sps:$4 sm:$0xff]  }
  0x8c   :  { %1336 = vmatpush1.bf16.msra.mxu1 %v2839_v4  ;;  %v2919_v4 = vld [vmem:[#allocation6 + $0x5a0] ss:$16 sps:$4 sm:$0xff]  }
  0x8d   :  { %1377 = vmatpush1.bf16.msra.mxu0 %v2840_v5  ;;  %1469 = vmatprep.subr.bf16.mxu1 %v2846_v9  ;;  %v2922_v5 = vld [vmem:[#allocation6 + $0x1a8] ss:$16 sps:$4 sm:$0xff]  }
  0x8e   :  { %1387 = vmatprep.subr.bf16.mxu0 %v2843_v7  ;;  %v2930_v7 = vld [vmem:[#allocation6 + $0x1cc] ss:$16 sps:$4 sm:$0xff]   ;;  %v2928_v9 = vld [vmem:[#allocation6 + $0x1c8] ss:$16 sps:$4 sm:$0xff]  }
  0x8f   :  { %1338 = vmatmul.mubr.bf16.vlgmr.msra.gmra.mrb[0].mxu1 %v3395_v10 }
  0x90   :  { %1379 = vmatmul.mubr.bf16.vlgmr.msra.gmra.mrb[0].mxu0 %v3397_v13  ;;  %1470 = vmatpush1.bf16.msra.mxu1 %v2844_v12  ;;  %v2936_v12 = vld [vmem:[#allocation6 + $0x1ec] ss:$16 sps:$4 sm:$0xff]  }
  0x91   :  { %1388 = vmatpush1.bf16.msra.mxu0 %v2841_v11  ;;  %1471 = vmatprep.subr.bf16.mxu1 %v2852_v15  ;;  %v2933_v11 = vld [vmem:[#allocation6 + $0x5e4] ss:$16 sps:$4 sm:$0xff]   ;;  %v2934_v15 = vld [vmem:[#allocation6 + $0x1e8] ss:$16 sps:$4 sm:$0xff]  }
  0x92   :  { %1389 = vmatprep.subr.bf16.mxu0 %v2849_v14  ;;  %1501 = vmatprep.mubr.bf16.mxu1 %v3389_v50  ;;  %v2900_v50 = vld [vmem:[#allocation6 + $0x12c] ss:$16 sps:$4 sm:$0xff]   ;;  %v2931_v14 = vld [vmem:[#allocation6 + $0x5e0] ss:$16 sps:$4 sm:$0xff]  }
  0x93   :  { %1419 = vmatprep.mubr.bf16.mxu0 %v3402_v38 }
  0x94   :  { %1472 = vmatpush1.bf16.msra.mxu1 %v2850_v17  ;;  %v2939_v17 = vld [vmem:[#allocation6 + $0x20c] ss:$16 sps:$4 sm:$0xff]  }
  0x95   :  { %1390 = vmatpush1.bf16.msra.mxu0 %v2847_v16  ;;  %1473 = vmatprep.subr.bf16.mxu1 %v2858_v20  ;;  %v93_v16 = vld [vmem:[#allocation3 + $0x20] sm:$0xff] }
  0x96   :  { %1391 = vmatprep.subr.bf16.mxu0 %v2855_v18  ;;  %v2945_v18 = vld [vmem:[#allocation6 + $0x604] ss:$16 sps:$4 sm:$0xff]   ;;  %v3405_v20 = vpack.c.bf16 %v93_v16, %v93_v16  ;;  %v2988_v16 = vld [vmem:[#allocation6 + $0x408] ss:$16 sps:$4 sm:$0xff]  }
  0x98   :  { %1474 = vmatpush1.bf16.msra.mxu1 %v2856_v22  ;;  %v2943_v22 = vld [vmem:[#allocation6 + $0x600] ss:$16 sps:$4 sm:$0xff]  }
  0x99   :  { %1392 = vmatpush1.bf16.msra.mxu0 %v2853_v21  ;;  %1475 = vmatprep.subr.bf16.mxu1 %v2864_v24  ;;  %v2937_v21 = vld [vmem:[#allocation6 + $0x208] ss:$16 sps:$4 sm:$0xff]   ;;  %v3035_v24 = vld [vmem:[#allocation6 + $0x60c] ss:$16 sps:$4 sm:$0xff]  }
  0x9a   :  { %1393 = vmatprep.subr.bf16.mxu0 %v2861_v23  ;;  %v2942_v23 = vld [vmem:[#allocation6 + $0x22c] ss:$16 sps:$4 sm:$0xff]  }
  0x9c   :  { %1476 = vmatpush1.bf16.msra.mxu1 %v2862_v26  ;;  %v2948_v26 = vld [vmem:[#allocation6 + $0x24c] ss:$16 sps:$4 sm:$0xff]  }
  0x9d   :  { %1394 = vmatpush1.bf16.msra.mxu0 %v2859_v25  ;;  %1477 = vmatprep.subr.bf16.mxu1 %v2870_v28  ;;  %v2940_v25 = vld [vmem:[#allocation6 + $0x228] ss:$16 sps:$4 sm:$0xff]  }
  0x9e   :  { %1395 = vmatprep.subr.bf16.mxu0 %v2867_v27  ;;  %v2946_v27 = vld [vmem:[#allocation6 + $0x248] ss:$16 sps:$4 sm:$0xff]  }
  0x9f   :  { %v95_v28 = vld [vmem:[#allocation3 + $0x30] sm:$0xff] }
  0xa0   :  { %1478 = vmatpush1.bf16.msra.mxu1 %v2868_v30  ;;  %v2949_v30 = vld [vmem:[#allocation6 + $0x268] ss:$16 sps:$4 sm:$0xff]  }
  0xa1   :  { %1396 = vmatpush1.bf16.msra.mxu0 %v2865_v29  ;;  %1479 = vmatprep.subr.bf16.mxu1 %v2876_v32  ;;  %v2951_v29 = vld [vmem:[#allocation6 + $0x26c] ss:$16 sps:$4 sm:$0xff]   ;;  %v102_v32 = vpack.c.bf16 %v95_v28, %v95_v28  ;;  %v3075_v28 = vld [vmem:[#allocation8 + $0xc0] ss:$8 sps:$4 sm:$0xff]  }
  0xa2   :  { %1397 = vmatprep.subr.bf16.mxu0 %v2873_v31  ;;  %v3033_v31 = vld [vmem:[#allocation6 + $0x608] ss:$16 sps:$4 sm:$0xff]  }
  0xa4   :  { %1480 = vmatpush1.bf16.msra.mxu1 %v2874_v34  ;;  %v2957_v34 = vld [vmem:[#allocation6 + $0x2ac] ss:$16 sps:$4 sm:$0xff]  }
  0xa5   :  { %1398 = vmatpush1.bf16.msra.mxu0 %v2871_v33  ;;  %1481 = vmatprep.subr.bf16.mxu1 %v2882_v36  ;;  %v2952_v33 = vld [vmem:[#allocation6 + $0x288] ss:$16 sps:$4 sm:$0xff]  }
  0xa6   :  { %1399 = vmatprep.subr.bf16.mxu0 %v2879_v35  ;;  %v2960_v35 = vld [vmem:[#allocation6 + $0x2cc] ss:$16 sps:$4 sm:$0xff]   ;;  %v2958_v36 = vld [vmem:[#allocation6 + $0x2c8] ss:$16 sps:$4 sm:$0xff]  }
  0xa8   :  { %1482 = vmatpush1.bf16.msra.mxu1 %v2880_v40  ;;  %v3041_v40 = vld [vmem:[#allocation8 + $0x4] ss:$8 sps:$4 sm:$0xff]  }
  0xa9   :  { %1400 = vmatpush1.bf16.msra.mxu0 %v2877_v39  ;;  %1483 = vmatprep.subr.bf16.mxu1 %v2888_v42  ;;  %v3039_v39 = vld [vmem:[#allocation8] ss:$8 sps:$4 sm:$0xff]  }
  0xaa   :  { %1401 = vmatprep.subr.bf16.mxu0 %v2885_v41  ;;  %v3044_v41 = vld [vmem:[#allocation8 + $0x14] ss:$8 sps:$4 sm:$0xff]   ;;  %v2961_v42 = vld [vmem:[#allocation6 + $0x2e8] ss:$16 sps:$4 sm:$0xff]  }
  0xac   :  { %1484 = vmatpush1.bf16.msra.mxu1 %v2886_v44  ;;  %v2966_v44 = vld [vmem:[#allocation6 + $0x30c] ss:$16 sps:$4 sm:$0xff]  }
  0xad   :  { %1402 = vmatpush1.bf16.msra.mxu0 %v2883_v43  ;;  %1485 = vmatprep.subr.bf16.mxu1 %v2894_v46  ;;  %v3042_v43 = vld [vmem:[#allocation8 + $0x10] ss:$8 sps:$4 sm:$0xff]   ;;  %v3045_v46 = vld [vmem:[#allocation8 + $0x20] ss:$8 sps:$4 sm:$0xff]  }
  0xae   :  { %1403 = vmatprep.subr.bf16.mxu0 %v2891_v45  ;;  %v2964_v45 = vld [vmem:[#allocation6 + $0x308] ss:$16 sps:$4 sm:$0xff]  }
  0xb0   :  { %1486 = vmatpush1.bf16.msra.mxu1 %v2892_v48  ;;  %v3050_v48 = vld [vmem:[#allocation8 + $0x34] ss:$8 sps:$4 sm:$0xff]  }
  0xb1   :  { %1404 = vmatpush1.bf16.msra.mxu0 %v2889_v47  ;;  %1487 = vmatprep.subr.bf16.mxu1 %v2900_v50  ;;  %v2969_v47 = vld [vmem:[#allocation6 + $0x32c] ss:$16 sps:$4 sm:$0xff]   ;;  %v3048_v50 = vld [vmem:[#allocation8 + $0x30] ss:$8 sps:$4 sm:$0xff]  }
  0xb2   :  { %1405 = vmatprep.subr.bf16.mxu0 %v2897_v49  ;;  %v2967_v49 = vld [vmem:[#allocation6 + $0x328] ss:$16 sps:$4 sm:$0xff]  }
  0xb4   :  { %1488 = vmatpush1.bf16.msra.mxu1 %v2898_v52  ;;  %v3053_v52 = vld [vmem:[#allocation8 + $0x44] ss:$8 sps:$4 sm:$0xff]  }
  0xb5   :  { %1406 = vmatpush1.bf16.msra.mxu0 %v2895_v51  ;;  %1489 = vmatprep.subr.bf16.mxu1 %v2906_v55  ;;  %v2972_v51 = vld [vmem:[#allocation6 + $0x34c] ss:$16 sps:$4 sm:$0xff]   ;;  %v3051_v55 = vld [vmem:[#allocation8 + $0x40] ss:$8 sps:$4 sm:$0xff]  }
  0xb6   :  { %1407 = vmatprep.subr.bf16.mxu0 %v2903_v53  ;;  %v2970_v53 = vld [vmem:[#allocation6 + $0x348] ss:$16 sps:$4 sm:$0xff]  }
  0xb8   :  { %1490 = vmatpush1.bf16.msra.mxu1 %v2904_v57  ;;  %v3056_v57 = vld [vmem:[#allocation8 + $0x54] ss:$8 sps:$4 sm:$0xff]  }
  0xb9   :  { %1408 = vmatpush1.bf16.msra.mxu0 %v2901_v56  ;;  %1491 = vmatprep.subr.bf16.mxu1 %v2912_v59  ;;  %v2975_v56 = vld [vmem:[#allocation6 + $0x36c] ss:$16 sps:$4 sm:$0xff]   ;;  %v3054_v59 = vld [vmem:[#allocation8 + $0x50] ss:$8 sps:$4 sm:$0xff]  }
  0xba   :  { %1409 = vmatprep.subr.bf16.mxu0 %v2909_v58  ;;  %v2973_v58 = vld [vmem:[#allocation6 + $0x368] ss:$16 sps:$4 sm:$0xff]  }
  0xbc   :  { %1492 = vmatpush1.bf16.msra.mxu1 %v2910_v61  ;;  %v3059_v61 = vld [vmem:[#allocation8 + $0x64] ss:$8 sps:$4 sm:$0xff]  }
  0xbd   :  { %1410 = vmatpush1.bf16.msra.mxu0 %v2907_v60  ;;  %1493 = vmatprep.subr.bf16.mxu1 %v2918_v63  ;;  %v2978_v60 = vld [vmem:[#allocation6 + $0x38c] ss:$16 sps:$4 sm:$0xff]   ;;  %v3057_v63 = vld [vmem:[#allocation8 + $0x60] ss:$8 sps:$4 sm:$0xff]  }
  0xbe   :  { %1411 = vmatprep.subr.bf16.mxu0 %v2915_v62  ;;  %v2976_v62 = vld [vmem:[#allocation6 + $0x388] ss:$16 sps:$4 sm:$0xff]  }
  0xc0   :  { %1494 = vmatpush1.bf16.msra.mxu1 %v2916_v1  ;;  %v3062_v1 = vld [vmem:[#allocation8 + $0x74] ss:$8 sps:$4 sm:$0xff]  }
  0xc1   :  { %1412 = vmatpush1.bf16.msra.mxu0 %v2913_v0  ;;  %1495 = vmatprep.subr.bf16.mxu1 %v2924_v3  ;;  %v2981_v0 = vld [vmem:[#allocation6 + $0x3ac] ss:$16 sps:$4 sm:$0xff]   ;;  %v3060_v3 = vld [vmem:[#allocation8 + $0x70] ss:$8 sps:$4 sm:$0xff]  }
  0xc2   :  { %1413 = vmatprep.subr.bf16.mxu0 %v2921_v2  ;;  %v2979_v2 = vld [vmem:[#allocation6 + $0x3a8] ss:$16 sps:$4 sm:$0xff]  }
  0xc4   :  { %1496 = vmatpush1.bf16.msra.mxu1 %v2922_v5  ;;  %v3065_v5 = vld [vmem:[#allocation8 + $0x84] ss:$8 sps:$4 sm:$0xff]  }
  0xc5   :  { %1414 = vmatpush1.bf16.msra.mxu0 %v2919_v4  ;;  %1497 = vmatprep.subr.bf16.mxu1 %v2930_v7  ;;  %v2984_v4 = vld [vmem:[#allocation6 + $0x3cc] ss:$16 sps:$4 sm:$0xff]   ;;  %v3063_v7 = vld [vmem:[#allocation8 + $0x80] ss:$8 sps:$4 sm:$0xff]  }
  0xc6   :  { %1415 = vmatprep.subr.bf16.mxu0 %v2927_v6  ;;  %v2982_v6 = vld [vmem:[#allocation6 + $0x3c8] ss:$16 sps:$4 sm:$0xff]  }
  0xc8   :  { %1498 = vmatpush1.bf16.msra.mxu1 %v2928_v9  ;;  %v3068_v9 = vld [vmem:[#allocation8 + $0x94] ss:$8 sps:$4 sm:$0xff]  }
  0xc9   :  { %1416 = vmatpush1.bf16.msra.mxu0 %v2925_v8  ;;  %1499 = vmatprep.subr.bf16.mxu1 %v2936_v12  ;;  %v2987_v8 = vld [vmem:[#allocation6 + $0x3ec] ss:$16 sps:$4 sm:$0xff]   ;;  %v3066_v12 = vld [vmem:[#allocation8 + $0x90] ss:$8 sps:$4 sm:$0xff]  }
  0xca   :  { %1417 = vmatprep.subr.bf16.mxu0 %v2933_v11  ;;  %v2985_v11 = vld [vmem:[#allocation6 + $0x3e8] ss:$16 sps:$4 sm:$0xff]  }
  0xcc   :  { %1500 = vmatpush1.bf16.msra.mxu1 %v2934_v15  ;;  %v3071_v15 = vld [vmem:[#allocation8 + $0xa4] ss:$8 sps:$4 sm:$0xff]  }
  0xcd   :  { %1418 = vmatpush1.bf16.msra.mxu0 %v2931_v14  ;;  %1510 = vmatprep.subr.bf16.mxu1 %v2939_v17  ;;  %v2990_v14 = vld [vmem:[#allocation6 + $0x40c] ss:$16 sps:$4 sm:$0xff]  }
  0xce   :  { %1428 = vmatprep.subr.bf16.mxu0 %v2945_v18  ;;  %v2993_v17 = vld [vmem:[#allocation6 + $0x42c] ss:$16 sps:$4 sm:$0xff]   ;;  %v3069_v18 = vld [vmem:[#allocation8 + $0xa0] ss:$8 sps:$4 sm:$0xff]  }
  0xcf   :  { %1502 = vmatmul.mubr.bf16.vlgmr.msra.gmra.mrb[4].mxu1 %v3395_v10  ;;  %v2954_v10 = vld [vmem:[#allocation6 + $0x28c] ss:$16 sps:$4 sm:$0xff]  }
  0xd0   :  { %1420 = vmatmul.mubr.bf16.vlgmr.msra.gmra.mrb[0].mxu0 %v3405_v20  ;;  %1511 = vmatpush1.bf16.msra.mxu1 %v2937_v21  ;;  %v3074_v21 = vld [vmem:[#allocation8 + $0xb4] ss:$8 sps:$4 sm:$0xff]  }
  0xd1   :  { %1429 = vmatpush1.bf16.msra.mxu0 %v2943_v22  ;;  %1512 = vmatprep.subr.bf16.mxu1 %v2942_v23  ;;  %v2991_v22 = vld [vmem:[#allocation6 + $0x428] ss:$16 sps:$4 sm:$0xff]   ;;  %v2996_v23 = vld [vmem:[#allocation6 + $0x44c] ss:$16 sps:$4 sm:$0xff]  }
  0xd2   :  { %1460 = vmatprep.mubr.bf16.mxu0 %v3283_v19  ;;  %1542 = vmatprep.mubr.bf16.mxu1 %v3391_v54  ;;  %v2955_v54 = vld [vmem:[#allocation6 + $0x2a8] ss:$16 sps:$4 sm:$0xff]  }
  0xd3   :  { %1592 = vmatprep.subr.bf16.mxu0 %v3035_v24  ;;  %v3072_v24 = vld [vmem:[#allocation8 + $0xb0] ss:$8 sps:$4 sm:$0xff]  }
  0xd4   :  { %1513 = vmatpush1.bf16.msra.mxu1 %v2940_v25  ;;  %v3077_v25 = vld [vmem:[#allocation8 + $0xc4] ss:$8 sps:$4 sm:$0xff]  }
  0xd5   :  { %1514 = vmatprep.subr.bf16.mxu1 %v2948_v26  ;;  %v2994_v26 = vld [vmem:[#allocation6 + $0x448] ss:$16 sps:$4 sm:$0xff]  }
  0xd8   :  { %1515 = vmatpush1.bf16.msra.mxu1 %v2946_v27  ;;  %v2999_v27 = vld [vmem:[#allocation6 + $0x46c] ss:$16 sps:$4 sm:$0xff]  }
  0xd9   :  { %1516 = vmatprep.subr.bf16.mxu1 %v2951_v29  ;;  %v3080_v29 = vld [vmem:[#allocation8 + $0xd4] ss:$8 sps:$4 sm:$0xff]  }
  0xdc   :  { %2586 = vmatmul.mubr.msk.bf16.vlgmr.msra.gmra.mrb[0].mxu0 %vm1301_vm0, %v102_v32  ;;  %1517 = vmatpush1.bf16.msra.mxu1 %v2949_v30  ;;  %v3002_v30 = vld [vmem:[#allocation6 + $0x48c] ss:$16 sps:$4 sm:$0xff]  }
  0xdd   :  { %1593 = vmatpush1.bf16.msra.mxu0 %v3033_v31  ;;  %1518 = vmatprep.subr.bf16.mxu1 %v2954_v10  ;;  %v3000_v31 = vld [vmem:[#allocation6 + $0x488] ss:$16 sps:$4 sm:$0xff]  }
  0xde   :  { %1624 = vmatprep.mubr.bf16.mxu0 %v3283_v19  ;;  %2045 = vmatprep.subr.bf16.mxu0 %v3041_v40  ;;  %v3047_v19 = vld [vmem:[#allocation8 + $0x24] ss:$8 sps:$4 sm:$0xff]   ;;  %v3003_v10 = vld [vmem:[#allocation6 + $0x4a8] ss:$16 sps:$4 sm:$0xff]  }
  0xdf   :  { %v3083_v40 = vld [vmem:[#allocation8 + $0xe4] ss:$8 sps:$4 sm:$0xff]  }
  0xe0   :  { %1519 = vmatpush1.bf16.msra.mxu1 %v2952_v33  ;;  %v3008_v33 = vld [vmem:[#allocation6 + $0x4cc] ss:$16 sps:$4 sm:$0xff]  }
  0xe1   :  { %1520 = vmatprep.subr.bf16.mxu1 %v2957_v34  ;;  %v3006_v34 = vld [vmem:[#allocation6 + $0x4c8] ss:$16 sps:$4 sm:$0xff]  }
  0xe4   :  { %2587 = vmatmul.mubr.msk.bf16.vlgmr.msra.gmra.mrb[4].mxu0 %vm1301_vm0, %v102_v32  ;;  %1521 = vmatpush1.bf16.msra.mxu1 %v2955_v54  ;;  %v3005_v32 = vld [vmem:[#allocation6 + $0x4ac] ss:$16 sps:$4 sm:$0xff]  }
  0xe5   :  { %1522 = vmatprep.subr.bf16.mxu1 %v2960_v35  ;;  %2046 = vmatpush1.bf16.msra.mxu0 %v3039_v39  ;;  %v3011_v54 = vld [vmem:[#allocation6 + $0x4ec] ss:$16 sps:$4 sm:$0xff]   ;;  %v3009_v35 = vld [vmem:[#allocation6 + $0x4e8] ss:$16 sps:$4 sm:$0xff]  }
  0xe6   :  { %2047 = vmatprep.subr.bf16.mxu0 %v3044_v41  ;;  %v3017_v39 = vld [vmem:[#allocation6 + $0x52c] ss:$16 sps:$4 sm:$0xff]   ;;  %v3081_v41 = vld [vmem:[#allocation8 + $0xe0] ss:$8 sps:$4 sm:$0xff]  }
  0xe8   :  { %1523 = vmatpush1.bf16.msra.mxu1 %v2958_v36  ;;  %v3014_v36 = vld [vmem:[#allocation6 + $0x50c] ss:$16 sps:$4 sm:$0xff]  }
  0xe9   :  { %1524 = vmatprep.subr.bf16.mxu1 %v2963_v37  ;;  %2048 = vmatpush1.bf16.msra.mxu0 %v3042_v43  ;;  %v3012_v37 = vld [vmem:[#allocation6 + $0x508] ss:$16 sps:$4 sm:$0xff]   ;;  %v3020_v43 = vld [vmem:[#allocation6 + $0x54c] ss:$16 sps:$4 sm:$0xff]  }
  0xea   :  { %2049 = vmatprep.subr.bf16.mxu0 %v3047_v19  ;;  %v3084_v19 = vld [vmem:[#allocation8 + $0xf0] ss:$8 sps:$4 sm:$0xff]  }
  0xec   :  { %1525 = vmatpush1.bf16.msra.mxu1 %v2961_v42  ;;  %v3015_v42 = vld [vmem:[#allocation6 + $0x528] ss:$16 sps:$4 sm:$0xff]  }
  0xed   :  { %1526 = vmatprep.subr.bf16.mxu1 %v2966_v44  ;;  %2050 = vmatpush1.bf16.msra.mxu0 %v3045_v46  ;;  %v3086_v44 = vld [vmem:[#allocation8 + $0xf4] ss:$8 sps:$4 sm:$0xff]  }
  0xee   :  { %2051 = vmatprep.subr.bf16.mxu0 %v3050_v48  ;;  %v3023_v46 = vld [vmem:[#allocation6 + $0x56c] ss:$16 sps:$4 sm:$0xff]  }
  0xef   :  { %v3089_v48 = vld [vmem:[#allocation8 + $0x104] ss:$8 sps:$4 sm:$0xff]  }
  0xf0   :  { %1527 = vmatpush1.bf16.msra.mxu1 %v2964_v45  ;;  %v3018_v45 = vld [vmem:[#allocation6 + $0x548] ss:$16 sps:$4 sm:$0xff]  }
  0xf1   :  { %1528 = vmatprep.subr.bf16.mxu1 %v2969_v47  ;;  %2052 = vmatpush1.bf16.msra.mxu0 %v3048_v50  ;;  %v3021_v47 = vld [vmem:[#allocation6 + $0x568] ss:$16 sps:$4 sm:$0xff]  }
  0xf2   :  { %2053 = vmatprep.subr.bf16.mxu0 %v3053_v52  ;;  %v3024_v50 = vld [vmem:[#allocation6 + $0x588] ss:$16 sps:$4 sm:$0xff]  }
  0xf3   :  { %v3027_v52 = vld [vmem:[#allocation6 + $0x5a8] ss:$16 sps:$4 sm:$0xff]  }
  0xf4   :  { %1529 = vmatpush1.bf16.msra.mxu1 %v2967_v49  ;;  %v3026_v49 = vld [vmem:[#allocation6 + $0x58c] ss:$16 sps:$4 sm:$0xff]  }
  0xf5   :  { %1530 = vmatprep.subr.bf16.mxu1 %v2972_v51  ;;  %2054 = vmatpush1.bf16.msra.mxu0 %v3051_v55  ;;  %v3029_v51 = vld [vmem:[#allocation6 + $0x5ac] ss:$16 sps:$4 sm:$0xff]   ;;  %v3030_v55 = vld [vmem:[#allocation6 + $0x5c8] ss:$16 sps:$4 sm:$0xff]  }
  0xf6   :  { %2055 = vmatprep.subr.bf16.mxu0 %v3056_v57  ;;  %v3036_v57 = vld [vmem:[#allocation6 + $0x5e8] ss:$16 sps:$4 sm:$0xff]  }
  0xf8   :  { %1531 = vmatpush1.bf16.msra.mxu1 %v2970_v53  ;;  %v3032_v53 = vld [vmem:[#allocation6 + $0x5cc] ss:$16 sps:$4 sm:$0xff]  }
  0xf9   :  { %1532 = vmatprep.subr.bf16.mxu1 %v2975_v56  ;;  %2056 = vmatpush1.bf16.msra.mxu0 %v3054_v59  ;;  %v3038_v56 = vld [vmem:[#allocation6 + $0x5ec] ss:$16 sps:$4 sm:$0xff]  }
  0xfa   :  { %2057 = vmatprep.subr.bf16.mxu0 %v3059_v61 }
  0xfc   :  { %1533 = vmatpush1.bf16.msra.mxu1 %v2973_v58 }
  0xfd   :  { %1534 = vmatprep.subr.bf16.mxu1 %v2978_v60  ;;  %2058 = vmatpush1.bf16.msra.mxu0 %v3057_v63 }
  0xfe   :  { %2059 = vmatprep.subr.bf16.mxu0 %v3062_v1  ;;  %v3423_v1 = vld [vmem:[%s3468_s2] sm:$0xf] }
 0x100   :  { %1535 = vmatpush1.bf16.msra.mxu1 %v2976_v62  ;;  %v301_v62 = vlaneseq }
 0x101   :  { %1536 = vmatprep.subr.bf16.mxu1 %v2981_v0  ;;  %2060 = vmatpush1.bf16.msra.mxu0 %v3060_v3 }
 0x102   :  { %2061 = vmatprep.subr.bf16.mxu0 %v3065_v5  ;;  %v3415_v63 = vshrl.u32 %v301_v62, 7  ;;  %v3131_v62 = vld [vmem:[#allocation8 + $0x1e4] ss:$8 sps:$4 sm:$0xff]  }
 0x104   :  { %1537 = vmatpush1.bf16.msra.mxu1 %v2979_v2  ;;  %v3418_v0 = vsub.s32 0, %v3415_v63  ;;  %v307_v2 = vsub.s32 1, %v3415_v63 }
 0x105   :  { %1538 = vmatprep.subr.bf16.mxu1 %v2984_v4  ;;  %2062 = vmatpush1.bf16.msra.mxu0 %v3063_v7  ;;  %v3135_v7 = vld [vmem:[#allocation9 + $0x40] sm:$0xff]  }
 0x106   :  { %2063 = vmatprep.subr.bf16.mxu0 %v3068_v9  ;;  %v308_v3 = vrot.slane %v3423_v1, %v307_v2  ;;  %v3137_v9 = vld [vmem:[#allocation9 + $0x48] sm:$0xff]  }
 0x108   :  { %1539 = vmatpush1.bf16.msra.mxu1 %v2982_v6 }
 0x109   :  { %1540 = vmatprep.subr.bf16.mxu1 %v2987_v8  ;;  %2064 = vmatpush1.bf16.msra.mxu0 %v3066_v12  ;;  %v3136_v8 = vld [vmem:[#allocation9] sm:$0xff]  }
 0x10a   :  { %2065 = vmatprep.subr.bf16.mxu0 %v3071_v15 }
 0x10c   :  { %1541 = vmatpush1.bf16.msra.mxu1 %v2985_v11 }
 0x10d   :  { %1551 = vmatprep.subr.bf16.mxu1 %v2990_v14  ;;  %2066 = vmatpush1.bf16.msra.mxu0 %v3069_v18  ;;  %v3138_v18 = vld [vmem:[#allocation9 + $0x8] sm:$0xff]  }
 0x10e   :  { %2067 = vmatprep.subr.bf16.mxu0 %v3074_v21 }
 0x10f   :  { %1543 = vmatmul.mubr.bf16.vlgmr.msra.gmra.mrb[4].mxu1 %v3397_v13  ;;  %v2997_v13 = vld [vmem:[#allocation6 + $0x468] ss:$16 sps:$4 sm:$0xff]  }
 0x110   :  { %1552 = vmatpush1.bf16.msra.mxu1 %v2988_v16  ;;  %1583 = vmatprep.mubr.bf16.mxu1 %v3402_v38  ;;  %v3078_v38 = vld [vmem:[#allocation8 + $0xd0] ss:$8 sps:$4 sm:$0xff]  }
 0x111   :  { %1553 = vmatprep.subr.bf16.mxu1 %v2993_v17  ;;  %2068 = vmatpush1.bf16.msra.mxu0 %v3072_v24 }
 0x112   :  { %2069 = vmatprep.subr.bf16.mxu0 %v3077_v25 }
 0x114   :  { %1554 = vmatpush1.bf16.msra.mxu1 %v2991_v22  ;;  %v3139_v22 = vld [vmem:[#allocation9 + $0x50] sm:$0xff]  }
 0x115   :  { %1555 = vmatprep.subr.bf16.mxu1 %v2996_v23  ;;  %2070 = vmatpush1.bf16.msra.mxu0 %v3075_v28 }
 0x116   :  { %2071 = vmatprep.subr.bf16.mxu0 %v3080_v29  ;;  %v3092_v29 = vld [vmem:[#allocation8 + $0x114] ss:$8 sps:$4 sm:$0xff]  }
 0x118   :  { %1556 = vmatpush1.bf16.msra.mxu1 %v2994_v26  ;;  %v3087_v26 = vld [vmem:[#allocation8 + $0x100] ss:$8 sps:$4 sm:$0xff]  }
 0x119   :  { %1557 = vmatprep.subr.bf16.mxu1 %v2999_v27  ;;  %2072 = vmatpush1.bf16.msra.mxu0 %v3078_v38  ;;  %v3140_v27 = vld [vmem:[#allocation9 + $0x10] sm:$0xff]  }
 0x11a   :  { %2073 = vmatprep.subr.bf16.mxu0 %v3083_v40  ;;  %v3096_v40 = vld [vmem:[#allocation8 + $0x130] ss:$8 sps:$4 sm:$0xff]  }
 0x11c   :  { %1558 = vmatpush1.bf16.msra.mxu1 %v2997_v13 }
 0x11d   :  { %1559 = vmatprep.subr.bf16.mxu1 %v3002_v30  ;;  %2074 = vmatpush1.bf16.msra.mxu0 %v3081_v41  ;;  %v3141_v30 = vld [vmem:[#allocation9 + $0x58] sm:$0xff]   ;;  %v3146_v41 = vld [vmem:[#allocation9 + $0x28] sm:$0xff]  }
 0x11e   :  { %2075 = vmatprep.subr.bf16.mxu0 %v3086_v44  ;;  %v3104_v44 = vld [vmem:[#allocation8 + $0x154] ss:$8 sps:$4 sm:$0xff]  }
 0x120   :  { %1560 = vmatpush1.bf16.msra.mxu1 %v3000_v31 }
 0x121   :  { %1561 = vmatprep.subr.bf16.mxu1 %v3005_v32  ;;  %2076 = vmatpush1.bf16.msra.mxu0 %v3084_v19  ;;  %v3090_v32 = vld [vmem:[#allocation8 + $0x110] ss:$8 sps:$4 sm:$0xff]  }
 0x122   :  { %2086 = vmatprep.subr.bf16.mxu0 %v3089_v48  ;;  %v3102_v19 = vld [vmem:[#allocation8 + $0x150] ss:$8 sps:$4 sm:$0xff]  }
 0x123   :  { %v3108_v48 = vld [vmem:[#allocation8 + $0x170] ss:$8 sps:$4 sm:$0xff]  }
 0x124   :  { %1562 = vmatpush1.bf16.msra.mxu1 %v3003_v10 }
 0x125   :  { %1563 = vmatprep.subr.bf16.mxu1 %v3008_v33  ;;  %v3142_v33 = vld [vmem:[#allocation9 + $0x18] sm:$0xff]  }
 0x128   :  { %1564 = vmatpush1.bf16.msra.mxu1 %v3006_v34  ;;  %v3095_v34 = vld [vmem:[#allocation8 + $0x124] ss:$8 sps:$4 sm:$0xff]  }
 0x129   :  { %1565 = vmatprep.subr.bf16.mxu1 %v3011_v54  ;;  %v3143_v54 = vld [vmem:[#allocation9 + $0x60] sm:$0xff]  }
 0x12c   :  { %1566 = vmatpush1.bf16.msra.mxu1 %v3009_v35  ;;  %v3093_v35 = vld [vmem:[#allocation8 + $0x120] ss:$8 sps:$4 sm:$0xff]  }
 0x12d   :  { %1567 = vmatprep.subr.bf16.mxu1 %v3014_v36  ;;  %v3144_v36 = vld [vmem:[#allocation9 + $0x20] sm:$0xff]  }
 0x130   :  { %1568 = vmatpush1.bf16.msra.mxu1 %v3012_v37  ;;  %v3098_v37 = vld [vmem:[#allocation8 + $0x134] ss:$8 sps:$4 sm:$0xff]  }
 0x131   :  { %1569 = vmatprep.subr.bf16.mxu1 %v3017_v39  ;;  %v3145_v39 = vld [vmem:[#allocation9 + $0x68] sm:$0xff]  }
 0x134   :  { %1570 = vmatpush1.bf16.msra.mxu1 %v3015_v42  ;;  %v3101_v42 = vld [vmem:[#allocation8 + $0x144] ss:$8 sps:$4 sm:$0xff]  }
 0x135   :  { %1571 = vmatprep.subr.bf16.mxu1 %v3020_v43  ;;  %v3099_v43 = vld [vmem:[#allocation8 + $0x140] ss:$8 sps:$4 sm:$0xff]  }
 0x138   :  { %1572 = vmatpush1.bf16.msra.mxu1 %v3018_v45  ;;  %v3107_v45 = vld [vmem:[#allocation8 + $0x164] ss:$8 sps:$4 sm:$0xff]  }
 0x139   :  { %1573 = vmatprep.subr.bf16.mxu1 %v3023_v46  ;;  %v3105_v46 = vld [vmem:[#allocation8 + $0x160] ss:$8 sps:$4 sm:$0xff]  }
 0x13c   :  { %1574 = vmatpush1.bf16.msra.mxu1 %v3021_v47  ;;  %v3110_v47 = vld [vmem:[#allocation8 + $0x174] ss:$8 sps:$4 sm:$0xff]  }
 0x13d   :  { %1575 = vmatprep.subr.bf16.mxu1 %v3026_v49  ;;  %v3113_v49 = vld [vmem:[#allocation8 + $0x184] ss:$8 sps:$4 sm:$0xff]  }
 0x140   :  { %1576 = vmatpush1.bf16.msra.mxu1 %v3024_v50  ;;  %v3111_v50 = vld [vmem:[#allocation8 + $0x180] ss:$8 sps:$4 sm:$0xff]  }
 0x141   :  { %1577 = vmatprep.subr.bf16.mxu1 %v3029_v51  ;;  %v3116_v51 = vld [vmem:[#allocation8 + $0x194] ss:$8 sps:$4 sm:$0xff]  }
 0x144   :  { %1578 = vmatpush1.bf16.msra.mxu1 %v3027_v52  ;;  %v3114_v52 = vld [vmem:[#allocation8 + $0x190] ss:$8 sps:$4 sm:$0xff]  }
 0x145   :  { %1579 = vmatprep.subr.bf16.mxu1 %v3032_v53  ;;  %v3119_v53 = vld [vmem:[#allocation8 + $0x1a4] ss:$8 sps:$4 sm:$0xff]  }
 0x148   :  { %1580 = vmatpush1.bf16.msra.mxu1 %v3030_v55  ;;  %v3117_v55 = vld [vmem:[#allocation8 + $0x1a0] ss:$8 sps:$4 sm:$0xff]  }
 0x149   :  { %1581 = vmatprep.subr.bf16.mxu1 %v3038_v56  ;;  %v3122_v56 = vld [vmem:[#allocation8 + $0x1b4] ss:$8 sps:$4 sm:$0xff]  }
 0x14c   :  { %1582 = vmatpush1.bf16.msra.mxu1 %v3036_v57  ;;  %v3120_v57 = vld [vmem:[#allocation8 + $0x1b0] ss:$8 sps:$4 sm:$0xff]  }
 0x14d   :  { %2670 = vmatprep.subr.bf16.mxu1 %v3135_v7 }
 0x14f   :  { %1584 = vmatmul.mubr.bf16.vlgmr.msra.gmra.mrb[4].mxu1 %v3405_v20  ;;  %v304_v20 = vrot.slane %v3423_v1, %v3418_v0 }
 0x150   :  { %2671 = vmatpush3.bf16.msra.mxu1 %v3136_v8 }
 0x151   :  { %2672 = vmatprep.subr.bf16.mxu1 %v3137_v9 }
 0x154   :  { %2673 = vmatpush3.bf16.msra.mxu1 %v3138_v18 }
 0x155   :  { %2674 = vmatprep.subr.bf16.mxu1 %v3139_v22 }
 0x158   :  { %2675 = vmatpush3.bf16.msra.mxu1 %v3140_v27  ;;  %v3148_v27 = vld [vmem:[#allocation9 + $0x30] sm:$0xff]  }
 0x159   :  { %2676 = vmatprep.subr.bf16.mxu1 %v3141_v30 }
 0x15c   :  { %2677 = vmatpush3.bf16.msra.mxu1 %v3142_v33 }
 0x15d   :  { %2678 = vmatprep.subr.bf16.mxu1 %v3143_v54 }
 0x160   :  { %2679 = vmatpush3.bf16.msra.mxu1 %v3144_v36 }
 0x161   :  { %2680 = vmatprep.subr.bf16.mxu1 %v3145_v39 }
 0x162   :  { %v1339_v58 = vpop.f32.mrb[0].mxu1 }
 0x163   :  { %v1341_v59 = vpop.f32.mrb[1].mxu1  ;;  %v1340_v4 = vadd.f32 %v1339_v58, %v304_v20  ;;  %v3125_v58 = vld [vmem:[#allocation8 + $0x1c4] ss:$8 sps:$4 sm:$0xff]   ;;  %v3129_v20 = vld [vmem:[#allocation8 + $0x1e0] ss:$8 sps:$4 sm:$0xff]  }
 0x164   :  { %v1343_v60 = vpop.f32.mrb[2].mxu1  ;;  %v1342_v5 = vadd.f32 %v1341_v59, %v308_v3  ;;  %2681 = vmatpush3.bf16.msra.mxu1 %v3146_v41  ;;  %v3123_v59 = vld [vmem:[#allocation8 + $0x1c0] ss:$8 sps:$4 sm:$0xff]   ;;  %v3134_v3 = vld [vmem:[#allocation8 + $0x1f4] ss:$8 sps:$4 sm:$0xff]  }
 0x165   :  { %v1344_v61 = vpop.f32.mrb[3].mxu1  ;;  %v3128_v60 = vld [vmem:[#allocation8 + $0x1d4] ss:$8 sps:$4 sm:$0xff]  }
 0x166   :  { %v3126_v61 = vld [vmem:[#allocation8 + $0x1d0] ss:$8 sps:$4 sm:$0xff]  }
 0x1af   :  { %v1462_v6 = vpop.f32.mrb[0].mxu0 }
 0x1b0   :  { %v2701_v11 = vadd.f32 %v1462_v6, %v1340_v4  ;;  %v1464_v12 = vpop.f32.mrb[1].mxu0  ;;  %v3132_v4 = vld [vmem:[#allocation8 + $0x1f0] ss:$8 sps:$4 sm:$0xff]   ;;  %v315_v6 = vsub.s32 3, %v3415_v63 }
 0x1b1   :  { %v2703_v14 = vadd.f32 %v1464_v12, %v1342_v5  ;;  %v1466_v15 = vpop.f32.mrb[2].mxu0  ;;  %v311_v5 = vsub.s32 2, %v3415_v63  ;;  %v2315_v63 = vld [vmem:[#allocation2] sm:$0x1] }
 0x1b2   :  { %vm1633_vm1 = vcmp.gt.f32.partialorder %v2701_v11, 0.0  ;;  %v1637_v16 = vmul.f32 0.2, %v2701_v11  ;;  %v1467_v17 = vpop.f32.mrb[3].mxu0  ;;  %v316_v8 = vrot.slane %v3423_v1, %v315_v6  ;;  %2318 = vperm.xlu0 %2744, %v2315_v63  }
 0x1b3   :  { %vm1634_vm2 = vcmp.gt.f32.partialorder %v2703_v14, 0.0  ;;  %v1638_v21 = vmul.f32 0.2, %v2703_v14  ;;  %v312_v7 = vrot.slane %v3423_v1, %v311_v5  ;;  %v3147_v1 = vld [vmem:[#allocation9 + $0x70] sm:$0xff]  }
 0x1b4   :  { %v1641_v23 = vsel %vm1633_vm1, %v2701_v11, %v1637_v16  ;;  %2682 = vmatprep.subr.bf16.mxu1 %v3147_v1 }
 0x1b5   :  { %v1642_v24 = vsel %vm1634_vm2, %v2703_v14, %v1638_v21  ;;  %v1645_v28 = vpack.c.bf16 %v1641_v23, %v1641_v23  ;;  %2683 = vmatpush3.bf16.msra.mxu1 %v3148_v27 }
 0x1b6   :  { %v1646_v25 = vpack.c.bf16 %v1642_v24, %v1642_v24 }
 0x1b7   :  { %v3431_v13 = vpop.f32.mrb[4].mxu0 }
 0x1b8   :  { %2077 = vmatprep.mubr.bf16.mxu0 %v1646_v25  ;;  %v3433_v38 = vpop.f32.mrb[5].mxu0 }
 0x1b9   :  { %2078 = vmatmul.mubr.bf16.vlgmr.msra.gmra.mrb[8].mxu0 %v1645_v28  ;;  %v1630_v31 = vpop.f32.mrb[6].mxu0  ;;  %v3149_v28 = vld [vmem:[#allocation9 + $0x78] sm:$0xff]  }
 0x1ba   :  { %2087 = vmatpush1.bf16.msra.mxu0 %v3087_v26  ;;  %v1631_v10 = vpop.f32.mrb[7].mxu0  ;;  %2684 = vmatprep.subr.bf16.mxu1 %v3149_v28 }
 0x1bb   :  { %2088 = vmatprep.subr.bf16.mxu0 %v3092_v29  ;;  %v3150_v29 = vld [vmem:[#allocation9 + $0x38] sm:$0xff]  }
 0x1bc   :  { %2685 = vmatpush3.bf16.msra.mxu1 %v3150_v29 }
 0x1be   :  { %2089 = vmatpush1.bf16.msra.mxu0 %v3090_v32 }
 0x1bf   :  { %2090 = vmatprep.subr.bf16.mxu0 %v3095_v34 }
 0x1c2   :  { %2091 = vmatpush1.bf16.msra.mxu0 %v3093_v35 }
 0x1c3   :  { %2092 = vmatprep.subr.bf16.mxu0 %v3098_v37 }
 0x1c6   :  { %2093 = vmatpush1.bf16.msra.mxu0 %v3096_v40 }
 0x1c7   :  { %2094 = vmatprep.subr.bf16.mxu0 %v3101_v42  ;;  %v3284_v42 = vmov 0.0  }
 0x1ca   :  { %2095 = vmatpush1.bf16.msra.mxu0 %v3099_v43  ;;  %v2652_v43 = vld [vmem:[%s3472_s6] ss:$0 sm:$0xff]  ;;  %s3286_s6 = smov [#allocation11]  }
 0x1cb   :  { %2096 = vmatprep.subr.bf16.mxu0 %v3104_v44  ;;  %s2379_s21 = sshll.u32 %s3286_s6, 4  ;;  %s2380_s21 = int_to_ptr.vmem [resolvable:$true] %s2379_s21 }
 0x1cc   :  { %s3247_s22 = scalar_lea.vmem %s2380_s21, 32  ;;  %p3248_p5 = scmp.lt.s32.totalorder %s2380_s21, %s2380_s21 }
 0x1ce   :  { %2097 = vmatpush1.bf16.msra.mxu0 %v3102_v19 }
 0x1cf   :  { %2098 = vmatprep.subr.bf16.mxu0 %v3107_v45 }
 0x1d2   :  { %2099 = vmatpush1.bf16.msra.mxu0 %v3105_v46 }
 0x1d3   :  { %2100 = vmatprep.subr.bf16.mxu0 %v3110_v47 }
 0x1d6   :  { %2101 = vmatpush1.bf16.msra.mxu0 %v3108_v48 }
 0x1d7   :  { %2102 = vmatprep.subr.bf16.mxu0 %v3113_v49 }
 0x1da   :  { %2103 = vmatpush1.bf16.msra.mxu0 %v3111_v50 }
 0x1db   :  { %2104 = vmatprep.subr.bf16.mxu0 %v3116_v51  ;;  %v2314_v51 = vld [vmem:[%s3473_s7] sm:$0x1]  ;;  %s3243_s7 = scalar_lea.vmem %s2380_s21, 16 }
 0x1dc   :  { %p3244_p4 = scmp.ne.s32.totalorder %s2380_s21, %s3243_s7  ;;  %p3249_p6 = scmp.lt.s32.totalorder %s3247_s22, %s3243_s7 }
 0x1de   :  { %2105 = vmatpush1.bf16.msra.mxu0 %v3114_v52  ;;  %p3250_p7 = por %p3249_p6, %p3248_p5 }
 0x1df   :  { %2106 = vmatprep.subr.bf16.mxu0 %v3119_v53 }
 0x1e0   :  { %p3251_p8 = pnand %p3250_p7, %p3244_p4 }
 0x1e2   :  { %2107 = vmatpush1.bf16.msra.mxu0 %v3117_v55 }
 0x1e3   :  { %2108 = vmatprep.subr.bf16.mxu0 %v3122_v56 }
 0x1e6   :  { %2109 = vmatpush1.bf16.msra.mxu0 %v3120_v57 }
 0x1e7   :  { %2110 = vmatprep.subr.bf16.mxu0 %v3125_v58 }
 0x1ea   :  { %2111 = vmatpush1.bf16.msra.mxu0 %v3123_v59 }
 0x1eb   :  { %2112 = vmatprep.subr.bf16.mxu0 %v3128_v60 }
 0x1ee   :  { %2113 = vmatpush1.bf16.msra.mxu0 %v3126_v61 }
 0x1ef   :  { %2114 = vmatprep.subr.bf16.mxu0 %v3131_v62 }
 0x1f2   :  { %2115 = vmatpush1.bf16.msra.mxu0 %v3129_v20 }
 0x1f3   :  { %2116 = vmatprep.subr.bf16.mxu0 %v3134_v3 }
 0x1f6   :  { %2117 = vmatpush1.bf16.msra.mxu0 %v3132_v4 }
 0x1f7   :  { %2694 = vmatprep.subr.bf16.mxu0 %v3284_v42 }
 0x222   :  { %v1585_v9 = vpop.f32.mrb[4].mxu1 }
 0x223   :  { %v2704_v11 = vadd.f32 %v1585_v9, %v312_v7  ;;  %v1587_v12 = vpop.f32.mrb[5].mxu1 }
 0x224   :  { %v2706_v14 = vadd.f32 %v1587_v12, %v316_v8  ;;  %v1589_v15 = vpop.f32.mrb[6].mxu1 }
 0x225   :  { %v2705_v16 = vadd.f32 %v2704_v11, %v3431_v13  ;;  %v1590_v17 = vpop.f32.mrb[7].mxu1  ;;  %v1713_v13 = vld [vmem:[%s3470_s4] sm:$0x3] }
 0x226   :  { %v2707_v18 = vadd.f32 %v2706_v14, %v3433_v38  ;;  %v1718_v30 = vrot.slane %v1713_v13, %v3418_v0  ;;  %v1722_v38 = vrot.slane %v1713_v13, %v307_v2 }
 0x227   :  { %vm1635_vm3 = vcmp.gt.f32.partialorder %v2705_v16, 0.0  ;;  %v1639_v21 = vmul.f32 0.2, %v2705_v16 }
 0x228   :  { %v1640_v22 = vmul.f32 0.2, %v2707_v18  ;;  %vm1636_vm4 = vcmp.gt.f32.partialorder %v2707_v18, 0.0 }
 0x229   :  { %v1643_v23 = vsel %vm1635_vm3, %v2705_v16, %v1639_v21 }
 0x22a   :  { %v1644_v24 = vsel %vm1636_vm4, %v2707_v18, %v1640_v22  ;;  %v1647_v26 = vpack.c.bf16 %v1643_v23, %v1643_v23 }
 0x22b   :  { %v1648_v25 = vpack.c.bf16 %v1644_v24, %v1644_v24 }
 0x22d   :  { %2118 = vmatprep.mubr.bf16.mxu0 %v1648_v25 }
 0x22e   :  { %2119 = vmatmul.mubr.bf16.vlgmr.msra.gmra.mrb[8].mxu0 %v1647_v26 }
 0x22f   :  { %2696 = vmatprep.mubr.msk.bf16.mxu0 %vm3285_vm7, %v3284_v42 }
 0x231   :  { %v2319_v52 = vpop.permute.xlu0 %2318 }
 0x232   :  { %v2324_v53 = vrot.slane %v2319_v52, %v3418_v0 }
 0x301   :  { %v2120_v31 = vpop.f32.mrb[8].mxu0 }
 0x302   :  { %v2708_v32 = vadd.f32 %v2120_v31, %v1718_v30  ;;  %v2122_v10 = vpop.f32.mrb[9].mxu0 }
 0x303   :  { %v2709_v33 = vadd.f32 %v2122_v10, %v1722_v38  ;;  %v2124_v34 = vpop.f32.mrb[10].mxu0 }
 0x304   :  { %vm2127_vm5 = vcmp.gt.f32.partialorder %v2708_v32, 0.0  ;;  %v2129_v54 = vmul.f32 0.2, %v2708_v32  ;;  %v2125_v35 = vpop.f32.mrb[11].mxu0 }
 0x305   :  { %vm2128_vm6 = vcmp.gt.f32.partialorder %v2709_v33, 0.0  ;;  %v2130_v36 = vmul.f32 0.2, %v2709_v33 }
 0x306   :  { %v2131_v37 = vsel %vm2127_vm5, %v2708_v32, %v2129_v54 }
 0x307   :  { %v2132_v39 = vsel %vm2128_vm6, %v2709_v33, %v2130_v36  ;;  %v2133_v41 = vpack.c.bf16 %v2131_v37, %v2131_v37 }
 0x308   :  { %v2134_v40 = vpack.c.bf16 %v2132_v39, %v2132_v39 }
 0x30a   :  { %2302 = vmatprep.mubr.bf16.mxu1 %v2134_v40 }
 0x30b   :  { %2303 = vmatmul.mubr.bf16.vlgmr.msra.gmra.mrb[8].mxu1 %v2133_v41 }
 0x3de   :  { %v2686_v2 = vpop.f32.mrb[8].mxu1 }
 0x3df   :  { %v2687_v44 = vpop.f32.mrb[9].mxu1 }
 0x3e0   :  { %v2688_v19 = vadd.f32 %v2687_v44, %v2686_v2  ;;  %v2689_v45 = vpop.f32.mrb[10].mxu1 }
 0x3e1   :  { %v2690_v46 = vpop.f32.mrb[11].mxu1 }
 0x3e2   :  { %v2305_v47 = vadd.f32 %v2688_v19, %v2652_v43 }
 0x3e4   :  { %vm2310_vm8 = vcmp.gt.f32.partialorder %v2305_v47, 0.0  ;;  %v2311_v48 = vmul.f32 0.2, %v2305_v47 }
 0x3e6   :  { %v2312_v49 = vsel %vm2310_vm8, %v2305_v47, %v2311_v48 }
 0x3e7   :  { %v2313_v50 = vpack.c.bf16 %v2312_v49, %v2312_v49 }
 0x3e9   :  { %2695 = vmatpush3.bf16.xpose.msra.mxu0 %v2313_v50 }
 0x3f0   :  { %2697 = vmatmul.mubr.bf16.vlgmr.msra.gmra.mrb[12].mxu0 %v2314_v51 }
 0x4c3   :  { %v2359_v55 = vpop.f32.mrb[12].mxu0 }
 0x4c4   :  { %v2360_v56 = vadd.f32 %v2359_v55, %v2324_v53  ;;  %v2698_v57 = vpop.f32.mrb[13].mxu0 }
 0x4c5   :  { %v2362_v58 = vpop.f32.mrb[14].mxu0 }
 0x4c6   :  { %v2669_v59 = vmul.f32 -1.442695, %v2360_v56  ;;  %v2699_v60 = vpop.f32.mrb[15].mxu0 }
 0x4c8   :  { %3151 = vpow2.f32 %v2669_v59 }
 0x4d2   :  { %v3152_v61 = vpop.eup %3151 }
 0x4d3   :  { %v2368_v62 = vadd.f32 1.0, %v3152_v61 }
 0x4d5   :  { %3153 = vrcp.f32 %v2368_v62 }
 0x4df   :  { %v3154_v20 = vpop.eup %3153 }
 0x4e0   :  { %2372 = vst.msk [vmem:[#allocation11] sm:$0x1] %vm2371_vm9, %v3154_v20 }
 0x4e1   :  { %3254 = shalt.err (!%p3251_p8)
}
 0x4e2   :  { %s3255_s24 = scalar_lea.hbm %s3475_s9, 16 }
 0x4e3   :  { %p3256_p9 = scmp.ne.s32.totalorder %s3475_s9, %s3255_s24  ;;  %p3259_p10 = scmp.lt.u32.totalorder %s3255_s24, %s3475_s9 }
 0x4e5   :  { %p3261_p11 = pnand %p3259_p10, %p3256_p9 }
 0x4e7   :  { %3264 = shalt.err (!%p3261_p11)
}
 0x4e8   :  { %2382 = dma.vmem_to_hbm [thread:$0]  %s2380_s21, 16, %s3475_s9, [#allocation5]  }
 0x4e9   :  { %3271 = dma.done.wait [#allocation5], 16  }
 0x4ea   :  { %3272 = vsyncadd [#allocation5], 4294967280 }
 0x4eb   :  { %2386 = vsyncpa [#allocation4], 1 }
 0x4ec   :  { %2387 = vsyncpa [#allocation7], 1 }
 0x4ed   :  { %2388 = vsyncpa [#allocation10], 1 }
 0x4ee   :  { %2389 = vsyncpa [#allocation5], 1 }

</bundles_post_ra>
